<compile_context>
chip_gen: v7x
topology: tpu7x:2x2x1
jax: 0.10.0
libtpu: 0.0.40
codegen_flags: <defaults>
</compile_context>

<pallas_src>
import jax
import jax.numpy as jnp
from jax.experimental import pallas as pl
from jax.experimental.pallas import tpu as pltpu


# ---------------------------------------------------------------------------
# Fused ResBlock kernel (one grid step == one batch element, whole image).
# ---------------------------------------------------------------------------
def _make_resblock_kernel(H, W, has_downsample):
    HW = H * W
    # shifted[p] = input[p + off] with off = (dy-1)*W + (dx-1)  ->  roll shift = -off
    shifts = [(-((dy - 1) * W + (dx - 1))) % HW
              for dy in range(3) for dx in range(3)]

    def kernel(*refs):
        if has_downsample:
            (w1_ref, b1_ref, w2_ref, b2_ref, wd_ref, bd_ref,
             mask_ref, x_ref, out_ref) = refs
        else:
            (w1_ref, b1_ref, w2_ref, b2_ref,
             mask_ref, x_ref, out_ref) = refs
            wd_ref = bd_ref = None

        def shifted_tap(a, k):
            # a: (C, HW) f32.  Static lane rotation + zero out padding / row-wrap.
            rolled = a if shifts[k] == 0 else pltpu.roll(a, shifts[k], axis=1)
            return rolled * mask_ref[k]            # mask_ref[k]: (1, HW) of 0/1

        def mxu(w_ref, k, tap_bf16, acc):
            # (Cout, Cin) bf16 @ (Cin, HW) bf16 -> (Cout, HW) f32 on the MXU.
            d = jax.lax.dot_general(w_ref[k], tap_bf16,
                                    (((1,), (0,)), ((), ())),
                                    preferred_element_type=jnp.float32)
            return d if acc is None else acc + d

        x = x_ref[0]                               # (Cin, HW) f32

        # conv1 (on relu(x)) and optional downsample (on raw x) share the taps.
        acc1 = None
        accd = None
        for k in range(9):
            t = shifted_tap(x, k)                  # f32, padding already zeroed
            acc1 = mxu(w1_ref, k, jnp.maximum(t, 0.0).astype(jnp.bfloat16), acc1)
            if has_downsample:
                accd = mxu(wd_ref, k, t.astype(jnp.bfloat16), accd)

        r = jnp.maximum(acc1 + b1_ref[...], 0.0)   # relu(conv1(relu(x)) + b1), f32
        skip = (accd + bd_ref[...]) if has_downsample else x

        # conv2 consumes r straight from VMEM (never written to HBM).
        acc2 = None
        for k in range(9):
            t = shifted_tap(r, k)
            acc2 = mxu(w2_ref, k, t.astype(jnp.bfloat16), acc2)

        out_ref[0] = (acc2 + b2_ref[...] + skip).astype(out_ref.dtype)

    return kernel


# ---------------------------------------------------------------------------
# Wrapper.
# ---------------------------------------------------------------------------
def res_block_forward(x, conv1_w, conv1_b, conv2_w, conv2_b,
                      downsample_w=None, downsample_b=None, stride=1):
    """ResBlock.forward: conv2(relu(conv1(relu(x)))) + (x or downsample(x))."""
    if stride != 1:
        # TODO(synk): strided conv path not implemented in Pallas.
        raise NotImplementedError("stride > 1 not supported by the Pallas path")

    N, Cin, H, W = x.shape
    Cout = conv1_w.shape[0]
    HW = H * W
    has_ds = downsample_w is not None
    if not has_ds:
        assert Cin == Cout, "identity skip requires indim == outdim"

    # Free contiguous reshape; x stays f32 in HBM (exact residual add).
    x_flat = x.astype(jnp.float32).reshape(N, Cin, HW)

    def prep_w(w):  # (Co, Ci, 3, 3) -> (9, Co, Ci) bf16, k = dy*3 + dx
        co, ci = w.shape[0], w.shape[1]
        return jnp.transpose(w.astype(jnp.float32), (2, 3, 0, 1)) \
                  .reshape(9, co, ci).astype(jnp.bfloat16)

    def prep_b(b):
        return b.astype(jnp.float32).reshape(-1, 1)

    w1 = prep_w(conv1_w); b1 = prep_b(conv1_b)
    w2 = prep_w(conv2_w); b2 = prep_b(conv2_b)

    # Tap validity masks (zero padding + suppress roll wraparound), shared by
    # conv1 / conv2 / downsample.  Tiny, resident in VMEM.
    p = jnp.arange(HW, dtype=jnp.int32)
    py, px = p // W, p % W
    masks = []
    for dy in range(3):
        for dx in range(3):
            valid = ((py + (dy - 1) >= 0) & (py + (dy - 1) < H) &
                     (px + (dx - 1) >= 0) & (px + (dx - 1) < W))
            masks.append(valid)
    mask = jnp.stack(masks).astype(jnp.float32).reshape(9, 1, HW)

    args = [w1, b1, w2, b2]
    in_specs = [
        pl.BlockSpec((9, Cout, Cin), lambda n: (0, 0, 0)),   # conv1 weights (resident)
        pl.BlockSpec((Cout, 1), lambda n: (0, 0)),           # conv1 bias
        pl.BlockSpec((9, Cout, Cout), lambda n: (0, 0, 0)),  # conv2 weights
        pl.BlockSpec((Cout, 1), lambda n: (0, 0)),           # conv2 bias
    ]
    if has_ds:
        wd = prep_w(downsample_w); bd = prep_b(downsample_b)
        args += [wd, bd]
        in_specs += [
            pl.BlockSpec((9, Cout, Cin), lambda n: (0, 0, 0)),
            pl.BlockSpec((Cout, 1), lambda n: (0, 0)),
        ]
    args += [mask, x_flat]
    in_specs += [
        pl.BlockSpec((9, 1, HW), lambda n: (0, 0, 0)),       # tap masks (resident)
        pl.BlockSpec((1, Cin, HW), lambda n: (n, 0, 0)),     # activation tile
    ]

    flops = 2 * N * HW * Cout * 9 * Cin + 2 * N * HW * Cout * 9 * Cout
    if has_ds:
        flops += 2 * N * HW * Cout * 9 * Cin
    out_bytes = 4 * N * Cout * HW
    bytes_accessed = out_bytes + sum(int(a.size) * a.dtype.itemsize for a in args)

    # Generation-aware VMEM limit (v7x has 64 MiB/TC; v5e/v6e have 128 MiB).
    try:
        vmem_cap = pltpu.get_tpu_info().vmem_capacity_bytes
    except Exception:
        vmem_cap = 64 * 1024 * 1024
    vmem_limit = int(min(vmem_cap * 3 // 4, 96 * 1024 * 1024))

    out = pl.pallas_call(
        _make_resblock_kernel(H, W, has_ds),
        out_shape=jax.ShapeDtypeStruct((N, Cout, HW), jnp.float32),
        grid=(N,),
        in_specs=in_specs,
        out_specs=pl.BlockSpec((1, Cout, HW), lambda n: (n, 0, 0)),
        compiler_params=pltpu.CompilerParams(
            dimension_semantics=("parallel",),
            vmem_limit_bytes=vmem_limit),
        cost_estimate=pl.CostEstimate(
            flops=int(flops), transcendentals=0,
            bytes_accessed=int(bytes_accessed)),
    )(*args)

    return out.reshape(N, Cout, H, W)


# ---------------------------------------------------------------------------
# Pure-JAX reference (XLA conv, full f32) for correctness checking.
# ---------------------------------------------------------------------------
def _ref_conv(x, w, b):
    out = jax.lax.conv_general_dilated(
        x, w, window_strides=(1, 1), padding=((1, 1), (1, 1)),
        dimension_numbers=("NCHW", "OIHW", "NCHW"))
    return out + b.reshape(1, -1, 1, 1)


def _ref_resblock(x, w1, b1, w2, b2, wd=None, bd=None):
    r = _ref_conv(jnp.maximum(x, 0.0), w1, b1)
    r = _ref_conv(jnp.maximum(r, 0.0), w2, b2)
    skip = x if wd is None else _ref_conv(x, wd, bd)
    return skip + r


if __name__ == "__main__":
    k = jax.random.split(jax.random.PRNGKey(0), 16)
    N, C, H, W = 2, 4, 16, 16

    # ---- Case 1: ResBlock(indim=4), stride=1 -> identity skip --------------
    x = jax.random.normal(k[0], (N, C, H, W), dtype=jnp.float32)
    w1 = jax.random.normal(k[1], (C, C, 3, 3), dtype=jnp.float32) * 0.1
    b1 = jax.random.normal(k[2], (C,), dtype=jnp.float32) * 0.1
    w2 = jax.random.normal(k[3], (C, C, 3, 3), dtype=jnp.float32) * 0.1
    b2 = jax.random.normal(k[4], (C,), dtype=jnp.float32) * 0.1

    out1 = jax.block_until_ready(res_block_forward(x, w1, b1, w2, b2))
    ref1 = _ref_resblock(x, w1, b1, w2, b2)
    assert out1.shape == (N, C, H, W)
    err1 = float(jnp.max(jnp.abs(out1 - ref1)))
    # bf16 MXU operands (f32 accumulate) -> loose tolerance vs. the f32 reference.
    assert err1 < 5e-2, f"case1 max|err|={err1}"

    # ---- Case 2: ResBlock(indim=4, outdim=8) -> 3x3 downsample on skip -----
    Co = 8
    w1b = jax.random.normal(k[5], (Co, C, 3, 3), dtype=jnp.float32) * 0.1
    b1b = jax.random.normal(k[6], (Co,), dtype=jnp.float32) * 0.1
    w2b = jax.random.normal(k[7], (Co, Co, 3, 3), dtype=jnp.float32) * 0.1
    b2b = jax.random.normal(k[8], (Co,), dtype=jnp.float32) * 0.1
    wd = jax.random.normal(k[9], (Co, C, 3, 3), dtype=jnp.float32) * 0.1
    bd = jax.random.normal(k[10], (Co,), dtype=jnp.float32) * 0.1

    out2 = jax.block_until_ready(
        res_block_forward(x, w1b, b1b, w2b, b2b, wd, bd))
    ref2 = _ref_resblock(x, w1b, b1b, w2b, b2b, wd, bd)
    assert out2.shape == (N, Co, H, W)
    err2 = float(jnp.max(jnp.abs(out2 - ref2)))
    assert err2 < 5e-2, f"case2 max|err|={err2}"

    print("KERNEL_OK")
</pallas_src>

<mosaic_0001>
module attributes {stable_mosaic.version = 11 : i64} {
  func.func @kernel(%arg0: i32, %arg1: memref<9x4x4xbf16, #tpu.memory_space<vmem>>, %arg2: memref<4x1xf32, #tpu.memory_space<vmem>>, %arg3: memref<9x4x4xbf16, #tpu.memory_space<vmem>>, %arg4: memref<4x1xf32, #tpu.memory_space<vmem>>, %arg5: memref<9x1x256xf32, #tpu.memory_space<vmem>>, %arg6: memref<1x4x256xf32, #tpu.memory_space<vmem>>, %arg7: memref<1x4x256xf32, #tpu.memory_space<vmem>>) attributes {dimension_semantics = [#tpu.dimension_semantics<parallel>], iteration_bounds = array<i64: 2>, scalar_prefetch = 0 : i64, scratch_operands = 0 : i64, tpu.core_type = #tpu.core_type<tc>, window_params = [{pipeline_mode = #tpu.pipeline_mode<synchronous>, transform_indices = @transform_0, window_bounds = array<i64: 9, 4, 4>}, {pipeline_mode = #tpu.pipeline_mode<synchronous>, transform_indices = @transform_1, window_bounds = array<i64: 4, 1>}, {pipeline_mode = #tpu.pipeline_mode<synchronous>, transform_indices = @transform_2, window_bounds = array<i64: 9, 4, 4>}, {pipeline_mode = #tpu.pipeline_mode<synchronous>, transform_indices = @transform_3, window_bounds = array<i64: 4, 1>}, {pipeline_mode = #tpu.pipeline_mode<synchronous>, transform_indices = @transform_4, window_bounds = array<i64: 9, 1, 256>}, {transform_indices = @transform_5, window_bounds = array<i64: 1, 4, 256>}, {transform_indices = @transform_6, window_bounds = array<i64: 1, 4, 256>}]} {
    %c0 = arith.constant 0 : index
    %c0_0 = arith.constant 0 : index
    %c0_1 = arith.constant 0 : index
    %0 = vector.load %arg6[%c0, %c0_0, %c0_1] : memref<1x4x256xf32, #tpu.memory_space<vmem>>, vector<1x4x256xf32>
    %1 = vector.shape_cast %0 : vector<1x4x256xf32> to vector<4x256xf32>
    %c17_i32 = arith.constant 17 : i32
    %2 = tpu.dynamic_rotate %1 by %c17_i32 dim 1 : vector<4x256xf32>, i32 -> vector<4x256xf32>
    %c0_2 = arith.constant 0 : index
    %c0_3 = arith.constant 0 : index
    %c0_4 = arith.constant 0 : index
    %3 = vector.load %arg5[%c0_2, %c0_3, %c0_4] : memref<9x1x256xf32, #tpu.memory_space<vmem>>, vector<1x1x256xf32>
    %4 = vector.shape_cast %3 : vector<1x1x256xf32> to vector<1x256xf32>
    %5 = vector.broadcast %4 : vector<1x256xf32> to vector<4x256xf32>
    %6 = arith.mulf %2, %5 : vector<4x256xf32>
    %cst = arith.constant 0.000000e+00 : f32
    %7 = vector.broadcast %cst : f32 to vector<4x256xf32>
    %8 = arith.maximumf %6, %7 : vector<4x256xf32>
    %9 = arith.truncf %8 : vector<4x256xf32> to vector<4x256xbf16>
    %c0_5 = arith.constant 0 : index
    %c0_6 = arith.constant 0 : index
    %c0_7 = arith.constant 0 : index
    %10 = vector.load %arg1[%c0_5, %c0_6, %c0_7] : memref<9x4x4xbf16, #tpu.memory_space<vmem>>, vector<1x4x4xbf16>
    %11 = vector.shape_cast %10 : vector<1x4x4xbf16> to vector<4x4xbf16>
    %cst_8 = arith.constant dense<0.000000e+00> : vector<4x256xf32>
    %12 = tpu.matmul %11, %9, %cst_8 {dimension_numbers = #tpu.dot_dimension_numbers<[1], [0], [0], [1], [0, 0, 1, 1], [], []>} : vector<4x4xbf16>, vector<4x256xbf16>, vector<4x256xf32> -> vector<4x256xf32>
    %c16_i32 = arith.constant 16 : i32
    %13 = tpu.dynamic_rotate %1 by %c16_i32 dim 1 : vector<4x256xf32>, i32 -> vector<4x256xf32>
    %c1 = arith.constant 1 : index
    %c0_9 = arith.constant 0 : index
    %c0_10 = arith.constant 0 : index
    %14 = vector.load %arg5[%c1, %c0_9, %c0_10] : memref<9x1x256xf32, #tpu.memory_space<vmem>>, vector<1x1x256xf32>
    %15 = vector.shape_cast %14 : vector<1x1x256xf32> to vector<1x256xf32>
    %16 = vector.broadcast %15 : vector<1x256xf32> to vector<4x256xf32>
    %17 = arith.mulf %13, %16 : vector<4x256xf32>
    %cst_11 = arith.constant 0.000000e+00 : f32
    %18 = vector.broadcast %cst_11 : f32 to vector<4x256xf32>
    %19 = arith.maximumf %17, %18 : vector<4x256xf32>
    %20 = arith.truncf %19 : vector<4x256xf32> to vector<4x256xbf16>
    %c1_12 = arith.constant 1 : index
    %c0_13 = arith.constant 0 : index
    %c0_14 = arith.constant 0 : index
    %21 = vector.load %arg1[%c1_12, %c0_13, %c0_14] : memref<9x4x4xbf16, #tpu.memory_space<vmem>>, vector<1x4x4xbf16>
    %22 = vector.shape_cast %21 : vector<1x4x4xbf16> to vector<4x4xbf16>
    %cst_15 = arith.constant dense<0.000000e+00> : vector<4x256xf32>
    %23 = tpu.matmul %22, %20, %cst_15 {dimension_numbers = #tpu.dot_dimension_numbers<[1], [0], [0], [1], [0, 0, 1, 1], [], []>} : vector<4x4xbf16>, vector<4x256xbf16>, vector<4x256xf32> -> vector<4x256xf32>
    %24 = arith.addf %12, %23 : vector<4x256xf32>
    %c15_i32 = arith.constant 15 : i32
    %25 = tpu.dynamic_rotate %1 by %c15_i32 dim 1 : vector<4x256xf32>, i32 -> vector<4x256xf32>
    %c2 = arith.constant 2 : index
    %c0_16 = arith.constant 0 : index
    %c0_17 = arith.constant 0 : index
    %26 = vector.load %arg5[%c2, %c0_16, %c0_17] : memref<9x1x256xf32, #tpu.memory_space<vmem>>, vector<1x1x256xf32>
    %27 = vector.shape_cast %26 : vector<1x1x256xf32> to vector<1x256xf32>
    %28 = vector.broadcast %27 : vector<1x256xf32> to vector<4x256xf32>
    %29 = arith.mulf %25, %28 : vector<4x256xf32>
    %cst_18 = arith.constant 0.000000e+00 : f32
    %30 = vector.broadcast %cst_18 : f32 to vector<4x256xf32>
    %31 = arith.maximumf %29, %30 : vector<4x256xf32>
    %32 = arith.truncf %31 : vector<4x256xf32> to vector<4x256xbf16>
    %c2_19 = arith.constant 2 : index
    %c0_20 = arith.constant 0 : index
    %c0_21 = arith.constant 0 : index
    %33 = vector.load %arg1[%c2_19, %c0_20, %c0_21] : memref<9x4x4xbf16, #tpu.memory_space<vmem>>, vector<1x4x4xbf16>
    %34 = vector.shape_cast %33 : vector<1x4x4xbf16> to vector<4x4xbf16>
    %cst_22 = arith.constant dense<0.000000e+00> : vector<4x256xf32>
    %35 = tpu.matmul %34, %32, %cst_22 {dimension_numbers = #tpu.dot_dimension_numbers<[1], [0], [0], [1], [0, 0, 1, 1], [], []>} : vector<4x4xbf16>, vector<4x256xbf16>, vector<4x256xf32> -> vector<4x256xf32>
    %36 = arith.addf %24, %35 : vector<4x256xf32>
    %c1_i32 = arith.constant 1 : i32
    %37 = tpu.dynamic_rotate %1 by %c1_i32 dim 1 : vector<4x256xf32>, i32 -> vector<4x256xf32>
    %c3 = arith.constant 3 : index
    %c0_23 = arith.constant 0 : index
    %c0_24 = arith.constant 0 : index
    %38 = vector.load %arg5[%c3, %c0_23, %c0_24] : memref<9x1x256xf32, #tpu.memory_space<vmem>>, vector<1x1x256xf32>
    %39 = vector.shape_cast %38 : vector<1x1x256xf32> to vector<1x256xf32>
    %40 = vector.broadcast %39 : vector<1x256xf32> to vector<4x256xf32>
    %41 = arith.mulf %37, %40 : vector<4x256xf32>
    %cst_25 = arith.constant 0.000000e+00 : f32
    %42 = vector.broadcast %cst_25 : f32 to vector<4x256xf32>
    %43 = arith.maximumf %41, %42 : vector<4x256xf32>
    %44 = arith.truncf %43 : vector<4x256xf32> to vector<4x256xbf16>
    %c3_26 = arith.constant 3 : index
    %c0_27 = arith.constant 0 : index
    %c0_28 = arith.constant 0 : index
    %45 = vector.load %arg1[%c3_26, %c0_27, %c0_28] : memref<9x4x4xbf16, #tpu.memory_space<vmem>>, vector<1x4x4xbf16>
    %46 = vector.shape_cast %45 : vector<1x4x4xbf16> to vector<4x4xbf16>
    %cst_29 = arith.constant dense<0.000000e+00> : vector<4x256xf32>
    %47 = tpu.matmul %46, %44, %cst_29 {dimension_numbers = #tpu.dot_dimension_numbers<[1], [0], [0], [1], [0, 0, 1, 1], [], []>} : vector<4x4xbf16>, vector<4x256xbf16>, vector<4x256xf32> -> vector<4x256xf32>
    %48 = arith.addf %36, %47 : vector<4x256xf32>
    %c4 = arith.constant 4 : index
    %c0_30 = arith.constant 0 : index
    %c0_31 = arith.constant 0 : index
    %49 = vector.load %arg5[%c4, %c0_30, %c0_31] : memref<9x1x256xf32, #tpu.memory_space<vmem>>, vector<1x1x256xf32>
    %50 = vector.shape_cast %49 : vector<1x1x256xf32> to vector<1x256xf32>
    %51 = vector.broadcast %50 : vector<1x256xf32> to vector<4x256xf32>
    %52 = arith.mulf %1, %51 : vector<4x256xf32>
    %cst_32 = arith.constant 0.000000e+00 : f32
    %53 = vector.broadcast %cst_32 : f32 to vector<4x256xf32>
    %54 = arith.maximumf %52, %53 : vector<4x256xf32>
    %55 = arith.truncf %54 : vector<4x256xf32> to vector<4x256xbf16>
    %c4_33 = arith.constant 4 : index
    %c0_34 = arith.constant 0 : index
    %c0_35 = arith.constant 0 : index
    %56 = vector.load %arg1[%c4_33, %c0_34, %c0_35] : memref<9x4x4xbf16, #tpu.memory_space<vmem>>, vector<1x4x4xbf16>
    %57 = vector.shape_cast %56 : vector<1x4x4xbf16> to vector<4x4xbf16>
    %cst_36 = arith.constant dense<0.000000e+00> : vector<4x256xf32>
    %58 = tpu.matmul %57, %55, %cst_36 {dimension_numbers = #tpu.dot_dimension_numbers<[1], [0], [0], [1], [0, 0, 1, 1], [], []>} : vector<4x4xbf16>, vector<4x256xbf16>, vector<4x256xf32> -> vector<4x256xf32>
    %59 = arith.addf %48, %58 : vector<4x256xf32>
    %c255_i32 = arith.constant 255 : i32
    %60 = tpu.dynamic_rotate %1 by %c255_i32 dim 1 : vector<4x256xf32>, i32 -> vector<4x256xf32>
    %c5 = arith.constant 5 : index
    %c0_37 = arith.constant 0 : index
    %c0_38 = arith.constant 0 : index
    %61 = vector.load %arg5[%c5, %c0_37, %c0_38] : memref<9x1x256xf32, #tpu.memory_space<vmem>>, vector<1x1x256xf32>
    %62 = vector.shape_cast %61 : vector<1x1x256xf32> to vector<1x256xf32>
    %63 = vector.broadcast %62 : vector<1x256xf32> to vector<4x256xf32>
    %64 = arith.mulf %60, %63 : vector<4x256xf32>
    %cst_39 = arith.constant 0.000000e+00 : f32
    %65 = vector.broadcast %cst_39 : f32 to vector<4x256xf32>
    %66 = arith.maximumf %64, %65 : vector<4x256xf32>
    %67 = arith.truncf %66 : vector<4x256xf32> to vector<4x256xbf16>
    %c5_40 = arith.constant 5 : index
    %c0_41 = arith.constant 0 : index
    %c0_42 = arith.constant 0 : index
    %68 = vector.load %arg1[%c5_40, %c0_41, %c0_42] : memref<9x4x4xbf16, #tpu.memory_space<vmem>>, vector<1x4x4xbf16>
    %69 = vector.shape_cast %68 : vector<1x4x4xbf16> to vector<4x4xbf16>
    %cst_43 = arith.constant dense<0.000000e+00> : vector<4x256xf32>
    %70 = tpu.matmul %69, %67, %cst_43 {dimension_numbers = #tpu.dot_dimension_numbers<[1], [0], [0], [1], [0, 0, 1, 1], [], []>} : vector<4x4xbf16>, vector<4x256xbf16>, vector<4x256xf32> -> vector<4x256xf32>
    %71 = arith.addf %59, %70 : vector<4x256xf32>
    %c241_i32 = arith.constant 241 : i32
    %72 = tpu.dynamic_rotate %1 by %c241_i32 dim 1 : vector<4x256xf32>, i32 -> vector<4x256xf32>
    %c6 = arith.constant 6 : index
    %c0_44 = arith.constant 0 : index
    %c0_45 = arith.constant 0 : index
    %73 = vector.load %arg5[%c6, %c0_44, %c0_45] : memref<9x1x256xf32, #tpu.memory_space<vmem>>, vector<1x1x256xf32>
    %74 = vector.shape_cast %73 : vector<1x1x256xf32> to vector<1x256xf32>
    %75 = vector.broadcast %74 : vector<1x256xf32> to vector<4x256xf32>
    %76 = arith.mulf %72, %75 : vector<4x256xf32>
    %cst_46 = arith.constant 0.000000e+00 : f32
    %77 = vector.broadcast %cst_46 : f32 to vector<4x256xf32>
    %78 = arith.maximumf %76, %77 : vector<4x256xf32>
    %79 = arith.truncf %78 : vector<4x256xf32> to vector<4x256xbf16>
    %c6_47 = arith.constant 6 : index
    %c0_48 = arith.constant 0 : index
    %c0_49 = arith.constant 0 : index
    %80 = vector.load %arg1[%c6_47, %c0_48, %c0_49] : memref<9x4x4xbf16, #tpu.memory_space<vmem>>, vector<1x4x4xbf16>
    %81 = vector.shape_cast %80 : vector<1x4x4xbf16> to vector<4x4xbf16>
    %cst_50 = arith.constant dense<0.000000e+00> : vector<4x256xf32>
    %82 = tpu.matmul %81, %79, %cst_50 {dimension_numbers = #tpu.dot_dimension_numbers<[1], [0], [0], [1], [0, 0, 1, 1], [], []>} : vector<4x4xbf16>, vector<4x256xbf16>, vector<4x256xf32> -> vector<4x256xf32>
    %83 = arith.addf %71, %82 : vector<4x256xf32>
    %c240_i32 = arith.constant 240 : i32
    %84 = tpu.dynamic_rotate %1 by %c240_i32 dim 1 : vector<4x256xf32>, i32 -> vector<4x256xf32>
    %c7 = arith.constant 7 : index
    %c0_51 = arith.constant 0 : index
    %c0_52 = arith.constant 0 : index
    %85 = vector.load %arg5[%c7, %c0_51, %c0_52] : memref<9x1x256xf32, #tpu.memory_space<vmem>>, vector<1x1x256xf32>
    %86 = vector.shape_cast %85 : vector<1x1x256xf32> to vector<1x256xf32>
    %87 = vector.broadcast %86 : vector<1x256xf32> to vector<4x256xf32>
    %88 = arith.mulf %84, %87 : vector<4x256xf32>
    %cst_53 = arith.constant 0.000000e+00 : f32
    %89 = vector.broadcast %cst_53 : f32 to vector<4x256xf32>
    %90 = arith.maximumf %88, %89 : vector<4x256xf32>
    %91 = arith.truncf %90 : vector<4x256xf32> to vector<4x256xbf16>
    %c7_54 = arith.constant 7 : index
    %c0_55 = arith.constant 0 : index
    %c0_56 = arith.constant 0 : index
    %92 = vector.load %arg1[%c7_54, %c0_55, %c0_56] : memref<9x4x4xbf16, #tpu.memory_space<vmem>>, vector<1x4x4xbf16>
    %93 = vector.shape_cast %92 : vector<1x4x4xbf16> to vector<4x4xbf16>
    %cst_57 = arith.constant dense<0.000000e+00> : vector<4x256xf32>
    %94 = tpu.matmul %93, %91, %cst_57 {dimension_numbers = #tpu.dot_dimension_numbers<[1], [0], [0], [1], [0, 0, 1, 1], [], []>} : vector<4x4xbf16>, vector<4x256xbf16>, vector<4x256xf32> -> vector<4x256xf32>
    %95 = arith.addf %83, %94 : vector<4x256xf32>
    %c239_i32 = arith.constant 239 : i32
    %96 = tpu.dynamic_rotate %1 by %c239_i32 dim 1 : vector<4x256xf32>, i32 -> vector<4x256xf32>
    %c8 = arith.constant 8 : index
    %c0_58 = arith.constant 0 : index
    %c0_59 = arith.constant 0 : index
    %97 = vector.load %arg5[%c8, %c0_58, %c0_59] : memref<9x1x256xf32, #tpu.memory_space<vmem>>, vector<1x1x256xf32>
    %98 = vector.shape_cast %97 : vector<1x1x256xf32> to vector<1x256xf32>
    %99 = vector.broadcast %98 : vector<1x256xf32> to vector<4x256xf32>
    %100 = arith.mulf %96, %99 : vector<4x256xf32>
    %cst_60 = arith.constant 0.000000e+00 : f32
    %101 = vector.broadcast %cst_60 : f32 to vector<4x256xf32>
    %102 = arith.maximumf %100, %101 : vector<4x256xf32>
    %103 = arith.truncf %102 : vector<4x256xf32> to vector<4x256xbf16>
    %c8_61 = arith.constant 8 : index
    %c0_62 = arith.constant 0 : index
    %c0_63 = arith.constant 0 : index
    %104 = vector.load %arg1[%c8_61, %c0_62, %c0_63] : memref<9x4x4xbf16, #tpu.memory_space<vmem>>, vector<1x4x4xbf16>
    %105 = vector.shape_cast %104 : vector<1x4x4xbf16> to vector<4x4xbf16>
    %cst_64 = arith.constant dense<0.000000e+00> : vector<4x256xf32>
    %106 = tpu.matmul %105, %103, %cst_64 {dimension_numbers = #tpu.dot_dimension_numbers<[1], [0], [0], [1], [0, 0, 1, 1], [], []>} : vector<4x4xbf16>, vector<4x256xbf16>, vector<4x256xf32> -> vector<4x256xf32>
    %107 = arith.addf %95, %106 : vector<4x256xf32>
    %c0_65 = arith.constant 0 : index
    %c0_66 = arith.constant 0 : index
    %108 = vector.load %arg2[%c0_65, %c0_66] : memref<4x1xf32, #tpu.memory_space<vmem>>, vector<4x1xf32>
    %109 = vector.broadcast %108 : vector<4x1xf32> to vector<4x256xf32>
    %110 = arith.addf %107, %109 : vector<4x256xf32>
    %cst_67 = arith.constant 0.000000e+00 : f32
    %111 = vector.broadcast %cst_67 : f32 to vector<4x256xf32>
    %112 = arith.maximumf %110, %111 : vector<4x256xf32>
    %c17_i32_68 = arith.constant 17 : i32
    %113 = tpu.dynamic_rotate %112 by %c17_i32_68 dim 1 : vector<4x256xf32>, i32 -> vector<4x256xf32>
    %c0_69 = arith.constant 0 : index
    %c0_70 = arith.constant 0 : index
    %c0_71 = arith.constant 0 : index
    %114 = vector.load %arg5[%c0_69, %c0_70, %c0_71] : memref<9x1x256xf32, #tpu.memory_space<vmem>>, vector<1x1x256xf32>
    %115 = vector.shape_cast %114 : vector<1x1x256xf32> to vector<1x256xf32>
    %116 = vector.broadcast %115 : vector<1x256xf32> to vector<4x256xf32>
    %117 = arith.mulf %113, %116 : vector<4x256xf32>
    %118 = arith.truncf %117 : vector<4x256xf32> to vector<4x256xbf16>
    %c0_72 = arith.constant 0 : index
    %c0_73 = arith.constant 0 : index
    %c0_74 = arith.constant 0 : index
    %119 = vector.load %arg3[%c0_72, %c0_73, %c0_74] : memref<9x4x4xbf16, #tpu.memory_space<vmem>>, vector<1x4x4xbf16>
    %120 = vector.shape_cast %119 : vector<1x4x4xbf16> to vector<4x4xbf16>
    %cst_75 = arith.constant dense<0.000000e+00> : vector<4x256xf32>
    %121 = tpu.matmul %120, %118, %cst_75 {dimension_numbers = #tpu.dot_dimension_numbers<[1], [0], [0], [1], [0, 0, 1, 1], [], []>} : vector<4x4xbf16>, vector<4x256xbf16>, vector<4x256xf32> -> vector<4x256xf32>
    %c16_i32_76 = arith.constant 16 : i32
    %122 = tpu.dynamic_rotate %112 by %c16_i32_76 dim 1 : vector<4x256xf32>, i32 -> vector<4x256xf32>
    %c1_77 = arith.constant 1 : index
    %c0_78 = arith.constant 0 : index
    %c0_79 = arith.constant 0 : index
    %123 = vector.load %arg5[%c1_77, %c0_78, %c0_79] : memref<9x1x256xf32, #tpu.memory_space<vmem>>, vector<1x1x256xf32>
    %124 = vector.shape_cast %123 : vector<1x1x256xf32> to vector<1x256xf32>
    %125 = vector.broadcast %124 : vector<1x256xf32> to vector<4x256xf32>
    %126 = arith.mulf %122, %125 : vector<4x256xf32>
    %127 = arith.truncf %126 : vector<4x256xf32> to vector<4x256xbf16>
    %c1_80 = arith.constant 1 : index
    %c0_81 = arith.constant 0 : index
    %c0_82 = arith.constant 0 : index
    %128 = vector.load %arg3[%c1_80, %c0_81, %c0_82] : memref<9x4x4xbf16, #tpu.memory_space<vmem>>, vector<1x4x4xbf16>
    %129 = vector.shape_cast %128 : vector<1x4x4xbf16> to vector<4x4xbf16>
    %cst_83 = arith.constant dense<0.000000e+00> : vector<4x256xf32>
    %130 = tpu.matmul %129, %127, %cst_83 {dimension_numbers = #tpu.dot_dimension_numbers<[1], [0], [0], [1], [0, 0, 1, 1], [], []>} : vector<4x4xbf16>, vector<4x256xbf16>, vector<4x256xf32> -> vector<4x256xf32>
    %131 = arith.addf %121, %130 : vector<4x256xf32>
    %c15_i32_84 = arith.constant 15 : i32
    %132 = tpu.dynamic_rotate %112 by %c15_i32_84 dim 1 : vector<4x256xf32>, i32 -> vector<4x256xf32>
    %c2_85 = arith.constant 2 : index
    %c0_86 = arith.constant 0 : index
    %c0_87 = arith.constant 0 : index
    %133 = vector.load %arg5[%c2_85, %c0_86, %c0_87] : memref<9x1x256xf32, #tpu.memory_space<vmem>>, vector<1x1x256xf32>
    %134 = vector.shape_cast %133 : vector<1x1x256xf32> to vector<1x256xf32>
    %135 = vector.broadcast %134 : vector<1x256xf32> to vector<4x256xf32>
    %136 = arith.mulf %132, %135 : vector<4x256xf32>
    %137 = arith.truncf %136 : vector<4x256xf32> to vector<4x256xbf16>
    %c2_88 = arith.constant 2 : index
    %c0_89 = arith.constant 0 : index
    %c0_90 = arith.constant 0 : index
    %138 = vector.load %arg3[%c2_88, %c0_89, %c0_90] : memref<9x4x4xbf16, #tpu.memory_space<vmem>>, vector<1x4x4xbf16>
    %139 = vector.shape_cast %138 : vector<1x4x4xbf16> to vector<4x4xbf16>
    %cst_91 = arith.constant dense<0.000000e+00> : vector<4x256xf32>
    %140 = tpu.matmul %139, %137, %cst_91 {dimension_numbers = #tpu.dot_dimension_numbers<[1], [0], [0], [1], [0, 0, 1, 1], [], []>} : vector<4x4xbf16>, vector<4x256xbf16>, vector<4x256xf32> -> vector<4x256xf32>
    %141 = arith.addf %131, %140 : vector<4x256xf32>
    %c1_i32_92 = arith.constant 1 : i32
    %142 = tpu.dynamic_rotate %112 by %c1_i32_92 dim 1 : vector<4x256xf32>, i32 -> vector<4x256xf32>
    %c3_93 = arith.constant 3 : index
    %c0_94 = arith.constant 0 : index
    %c0_95 = arith.constant 0 : index
    %143 = vector.load %arg5[%c3_93, %c0_94, %c0_95] : memref<9x1x256xf32, #tpu.memory_space<vmem>>, vector<1x1x256xf32>
    %144 = vector.shape_cast %143 : vector<1x1x256xf32> to vector<1x256xf32>
    %145 = vector.broadcast %144 : vector<1x256xf32> to vector<4x256xf32>
    %146 = arith.mulf %142, %145 : vector<4x256xf32>
    %147 = arith.truncf %146 : vector<4x256xf32> to vector<4x256xbf16>
    %c3_96 = arith.constant 3 : index
    %c0_97 = arith.constant 0 : index
    %c0_98 = arith.constant 0 : index
    %148 = vector.load %arg3[%c3_96, %c0_97, %c0_98] : memref<9x4x4xbf16, #tpu.memory_space<vmem>>, vector<1x4x4xbf16>
    %149 = vector.shape_cast %148 : vector<1x4x4xbf16> to vector<4x4xbf16>
    %cst_99 = arith.constant dense<0.000000e+00> : vector<4x256xf32>
    %150 = tpu.matmul %149, %147, %cst_99 {dimension_numbers = #tpu.dot_dimension_numbers<[1], [0], [0], [1], [0, 0, 1, 1], [], []>} : vector<4x4xbf16>, vector<4x256xbf16>, vector<4x256xf32> -> vector<4x256xf32>
    %151 = arith.addf %141, %150 : vector<4x256xf32>
    %c4_100 = arith.constant 4 : index
    %c0_101 = arith.constant 0 : index
    %c0_102 = arith.constant 0 : index
    %152 = vector.load %arg5[%c4_100, %c0_101, %c0_102] : memref<9x1x256xf32, #tpu.memory_space<vmem>>, vector<1x1x256xf32>
    %153 = vector.shape_cast %152 : vector<1x1x256xf32> to vector<1x256xf32>
    %154 = vector.broadcast %153 : vector<1x256xf32> to vector<4x256xf32>
    %155 = arith.mulf %112, %154 : vector<4x256xf32>
    %156 = arith.truncf %155 : vector<4x256xf32> to vector<4x256xbf16>
    %c4_103 = arith.constant 4 : index
    %c0_104 = arith.constant 0 : index
    %c0_105 = arith.constant 0 : index
    %157 = vector.load %arg3[%c4_103, %c0_104, %c0_105] : memref<9x4x4xbf16, #tpu.memory_space<vmem>>, vector<1x4x4xbf16>
    %158 = vector.shape_cast %157 : vector<1x4x4xbf16> to vector<4x4xbf16>
    %cst_106 = arith.constant dense<0.000000e+00> : vector<4x256xf32>
    %159 = tpu.matmul %158, %156, %cst_106 {dimension_numbers = #tpu.dot_dimension_numbers<[1], [0], [0], [1], [0, 0, 1, 1], [], []>} : vector<4x4xbf16>, vector<4x256xbf16>, vector<4x256xf32> -> vector<4x256xf32>
    %160 = arith.addf %151, %159 : vector<4x256xf32>
    %c255_i32_107 = arith.constant 255 : i32
    %161 = tpu.dynamic_rotate %112 by %c255_i32_107 dim 1 : vector<4x256xf32>, i32 -> vector<4x256xf32>
    %c5_108 = arith.constant 5 : index
    %c0_109 = arith.constant 0 : index
    %c0_110 = arith.constant 0 : index
    %162 = vector.load %arg5[%c5_108, %c0_109, %c0_110] : memref<9x1x256xf32, #tpu.memory_space<vmem>>, vector<1x1x256xf32>
    %163 = vector.shape_cast %162 : vector<1x1x256xf32> to vector<1x256xf32>
    %164 = vector.broadcast %163 : vector<1x256xf32> to vector<4x256xf32>
    %165 = arith.mulf %161, %164 : vector<4x256xf32>
    %166 = arith.truncf %165 : vector<4x256xf32> to vector<4x256xbf16>
    %c5_111 = arith.constant 5 : index
    %c0_112 = arith.constant 0 : index
    %c0_113 = arith.constant 0 : index
    %167 = vector.load %arg3[%c5_111, %c0_112, %c0_113] : memref<9x4x4xbf16, #tpu.memory_space<vmem>>, vector<1x4x4xbf16>
    %168 = vector.shape_cast %167 : vector<1x4x4xbf16> to vector<4x4xbf16>
    %cst_114 = arith.constant dense<0.000000e+00> : vector<4x256xf32>
    %169 = tpu.matmul %168, %166, %cst_114 {dimension_numbers = #tpu.dot_dimension_numbers<[1], [0], [0], [1], [0, 0, 1, 1], [], []>} : vector<4x4xbf16>, vector<4x256xbf16>, vector<4x256xf32> -> vector<4x256xf32>
    %170 = arith.addf %160, %169 : vector<4x256xf32>
    %c241_i32_115 = arith.constant 241 : i32
    %171 = tpu.dynamic_rotate %112 by %c241_i32_115 dim 1 : vector<4x256xf32>, i32 -> vector<4x256xf32>
    %c6_116 = arith.constant 6 : index
    %c0_117 = arith.constant 0 : index
    %c0_118 = arith.constant 0 : index
    %172 = vector.load %arg5[%c6_116, %c0_117, %c0_118] : memref<9x1x256xf32, #tpu.memory_space<vmem>>, vector<1x1x256xf32>
    %173 = vector.shape_cast %172 : vector<1x1x256xf32> to vector<1x256xf32>
    %174 = vector.broadcast %173 : vector<1x256xf32> to vector<4x256xf32>
    %175 = arith.mulf %171, %174 : vector<4x256xf32>
    %176 = arith.truncf %175 : vector<4x256xf32> to vector<4x256xbf16>
    %c6_119 = arith.constant 6 : index
    %c0_120 = arith.constant 0 : index
    %c0_121 = arith.constant 0 : index
    %177 = vector.load %arg3[%c6_119, %c0_120, %c0_121] : memref<9x4x4xbf16, #tpu.memory_space<vmem>>, vector<1x4x4xbf16>
    %178 = vector.shape_cast %177 : vector<1x4x4xbf16> to vector<4x4xbf16>
    %cst_122 = arith.constant dense<0.000000e+00> : vector<4x256xf32>
    %179 = tpu.matmul %178, %176, %cst_122 {dimension_numbers = #tpu.dot_dimension_numbers<[1], [0], [0], [1], [0, 0, 1, 1], [], []>} : vector<4x4xbf16>, vector<4x256xbf16>, vector<4x256xf32> -> vector<4x256xf32>
    %180 = arith.addf %170, %179 : vector<4x256xf32>
    %c240_i32_123 = arith.constant 240 : i32
    %181 = tpu.dynamic_rotate %112 by %c240_i32_123 dim 1 : vector<4x256xf32>, i32 -> vector<4x256xf32>
    %c7_124 = arith.constant 7 : index
    %c0_125 = arith.constant 0 : index
    %c0_126 = arith.constant 0 : index
    %182 = vector.load %arg5[%c7_124, %c0_125, %c0_126] : memref<9x1x256xf32, #tpu.memory_space<vmem>>, vector<1x1x256xf32>
    %183 = vector.shape_cast %182 : vector<1x1x256xf32> to vector<1x256xf32>
    %184 = vector.broadcast %183 : vector<1x256xf32> to vector<4x256xf32>
    %185 = arith.mulf %181, %184 : vector<4x256xf32>
    %186 = arith.truncf %185 : vector<4x256xf32> to vector<4x256xbf16>
    %c7_127 = arith.constant 7 : index
    %c0_128 = arith.constant 0 : index
    %c0_129 = arith.constant 0 : index
    %187 = vector.load %arg3[%c7_127, %c0_128, %c0_129] : memref<9x4x4xbf16, #tpu.memory_space<vmem>>, vector<1x4x4xbf16>
    %188 = vector.shape_cast %187 : vector<1x4x4xbf16> to vector<4x4xbf16>
    %cst_130 = arith.constant dense<0.000000e+00> : vector<4x256xf32>
    %189 = tpu.matmul %188, %186, %cst_130 {dimension_numbers = #tpu.dot_dimension_numbers<[1], [0], [0], [1], [0, 0, 1, 1], [], []>} : vector<4x4xbf16>, vector<4x256xbf16>, vector<4x256xf32> -> vector<4x256xf32>
    %190 = arith.addf %180, %189 : vector<4x256xf32>
    %c239_i32_131 = arith.constant 239 : i32
    %191 = tpu.dynamic_rotate %112 by %c239_i32_131 dim 1 : vector<4x256xf32>, i32 -> vector<4x256xf32>
    %c8_132 = arith.constant 8 : index
    %c0_133 = arith.constant 0 : index
    %c0_134 = arith.constant 0 : index
    %192 = vector.load %arg5[%c8_132, %c0_133, %c0_134] : memref<9x1x256xf32, #tpu.memory_space<vmem>>, vector<1x1x256xf32>
    %193 = vector.shape_cast %192 : vector<1x1x256xf32> to vector<1x256xf32>
    %194 = vector.broadcast %193 : vector<1x256xf32> to vector<4x256xf32>
    %195 = arith.mulf %191, %194 : vector<4x256xf32>
    %196 = arith.truncf %195 : vector<4x256xf32> to vector<4x256xbf16>
    %c8_135 = arith.constant 8 : index
    %c0_136 = arith.constant 0 : index
    %c0_137 = arith.constant 0 : index
    %197 = vector.load %arg3[%c8_135, %c0_136, %c0_137] : memref<9x4x4xbf16, #tpu.memory_space<vmem>>, vector<1x4x4xbf16>
    %198 = vector.shape_cast %197 : vector<1x4x4xbf16> to vector<4x4xbf16>
    %cst_138 = arith.constant dense<0.000000e+00> : vector<4x256xf32>
    %199 = tpu.matmul %198, %196, %cst_138 {dimension_numbers = #tpu.dot_dimension_numbers<[1], [0], [0], [1], [0, 0, 1, 1], [], []>} : vector<4x4xbf16>, vector<4x256xbf16>, vector<4x256xf32> -> vector<4x256xf32>
    %200 = arith.addf %190, %199 : vector<4x256xf32>
    %c0_139 = arith.constant 0 : index
    %c0_140 = arith.constant 0 : index
    %201 = vector.load %arg4[%c0_139, %c0_140] : memref<4x1xf32, #tpu.memory_space<vmem>>, vector<4x1xf32>
    %202 = vector.broadcast %201 : vector<4x1xf32> to vector<4x256xf32>
    %203 = arith.addf %200, %202 : vector<4x256xf32>
    %204 = arith.addf %203, %1 : vector<4x256xf32>
    %c0_141 = arith.constant 0 : index
    %c0_142 = arith.constant 0 : index
    %c0_143 = arith.constant 0 : index
    %205 = vector.load %arg7[%c0_141, %c0_142, %c0_143] : memref<1x4x256xf32, #tpu.memory_space<vmem>>, vector<1x4x256xf32>
    %206 = vector.shape_cast %205 : vector<1x4x256xf32> to vector<4x256xf32>
    %207 = vector.shape_cast %204 : vector<4x256xf32> to vector<1x4x256xf32>
    tpu.vector_store %arg7[%c0_141, %c0_142, %c0_143], %207 {strides = array<i32>} : memref<1x4x256xf32, #tpu.memory_space<vmem>>, vector<1x4x256xf32>,
    return
  }
  func.func @transform_0(%arg0: i32) -> (i32, i32, i32) {
    %c0_i32 = arith.constant 0 : i32
    %c0_i32_0 = arith.constant 0 : i32
    %c0_i32_1 = arith.constant 0 : i32
    %c0_i32_2 = arith.constant 0 : i32
    return %c0_i32, %c0_i32_0, %c0_i32_1 : i32, i32, i32
  }
  func.func @transform_1(%arg0: i32) -> (i32, i32) {
    %c0_i32 = arith.constant 0 : i32
    %c0_i32_0 = arith.constant 0 : i32
    %c0_i32_1 = arith.constant 0 : i32
    return %c0_i32, %c0_i32_0 : i32, i32
  }
  func.func @transform_2(%arg0: i32) -> (i32, i32, i32) {
    %c0_i32 = arith.constant 0 : i32
    %c0_i32_0 = arith.constant 0 : i32
    %c0_i32_1 = arith.constant 0 : i32
    %c0_i32_2 = arith.constant 0 : i32
    return %c0_i32, %c0_i32_0, %c0_i32_1 : i32, i32, i32
  }
  func.func @transform_3(%arg0: i32) -> (i32, i32) {
    %c0_i32 = arith.constant 0 : i32
    %c0_i32_0 = arith.constant 0 : i32
    %c0_i32_1 = arith.constant 0 : i32
    return %c0_i32, %c0_i32_0 : i32, i32
  }
  func.func @transform_4(%arg0: i32) -> (i32, i32, i32) {
    %c0_i32 = arith.constant 0 : i32
    %c0_i32_0 = arith.constant 0 : i32
    %c0_i32_1 = arith.constant 0 : i32
    %c0_i32_2 = arith.constant 0 : i32
    return %c0_i32, %c0_i32_0, %c0_i32_1 : i32, i32, i32
  }
  func.func @transform_5(%arg0: i32) -> (i32, i32, i32) {
    %c0_i32 = arith.constant 0 : i32
    %c0_i32_0 = arith.constant 0 : i32
    %c0_i32_1 = arith.constant 0 : i32
    return %arg0, %c0_i32, %c0_i32_0 : i32, i32, i32
  }
  func.func @transform_6(%arg0: i32) -> (i32, i32, i32) {
    %c0_i32 = arith.constant 0 : i32
    %c0_i32_0 = arith.constant 0 : i32
    %c0_i32_1 = arith.constant 0 : i32
    return %arg0, %c0_i32, %c0_i32_0 : i32, i32, i32
  }
}

</mosaic_0001>

<bundles_post_ra>
// kernel: tpu_custom_call.1
= control target key start
LH: loop header
LB: loop body
LE: loop exit
PB: predicated region body
PF: predicated region fallthrough
CT: control target
= control target key end

     0   :  { %11 = vsyncpa [#allocation3], 0  ;;  %s2357_s0 = inlined_call_operand.vmem [shape: bf16[9,4,4], index: 0, kind: input, shape index: {}]   ;;  %s2358_s1 = inlined_call_operand.vmem [shape: f32[4,1], index: 1, kind: input, shape index: {}]   ;;  %s2359_s2 = inlined_call_operand.vmem [shape: bf16[9,4,4], index: 2, kind: input, shape index: {}]   ;;  %s2360_s3 = inlined_call_operand.vmem [shape: f32[4,1], index: 3, kind: input, shape index: {}]   ;;  %s2361_s4 = inlined_call_operand.vmem [shape: f32[9,1,256], index: 4, kind: input, shape index: {}]   ;;  %s2362_s5 = inlined_call_operand.vmem [shape: f32[2,4,256], index: 5, kind: input, shape index: {}]   ;;  %s2363_s6 = inlined_call_operand.hbm [shape: f32[2,4,256], index: 6, kind: output, shape index: {}]  }
   0x1   :  { %13 = vsyncpa [#allocation3 + $0x1], 0  ;;  %s1866_s21 = smov 0   ;;  %s1868_s22 = smov 0  }
   0x2   :  { %s1870_s23 = smov 0   ;;  %s1872_s24 = smov 0  }
   0x3 LB: > { %s1887_s25 = sadd.s32 4294967295, %s1819_s24   ;;  %s1633_s26 = sadd.s32 4294967294, %s1819_s24   ;;  %s1819_s24 = sphi %s1872_s24, %s2369_s24   ;;  %s1815_s23 = sphi %s1870_s23, %s2368_s23   ;;  %s1811_s22 = sphi %s1868_s22, %s2367_s22   ;;  %s1807_s21 = sphi %s1866_s21, %s2366_s21  }
   0x4   : > { %s1891_s27 = sadd.s32 1, %s1819_s24   ;;  %s157_s28 = sadd.s32 1, %s1815_s23 }
   0x5   : > { %s154_s29 = ssub.s32 %s1819_s24, %s1891_s27  ;;  %p167_p0 = scmp.ne.s32.totalorder %s1815_s23, %s1811_s22 }
   0x6   : > { %p155_p1 = scmp.eq.s32.totalorder %s154_s29, 0  ;;  %p168_p2 = scmp.eq.s32.totalorder %s1887_s25, 1 }
   0x7   : > { %p173_p3 = scmp.ne.s32.totalorder %s1811_s22, %s1807_s21  ;;  %p174_p4 = scmp.eq.s32.totalorder %s1633_s26, 1 }
   0x8   : > { %s1902_s30 = scalar_select %p155_p1, %s1815_s23, %s157_s28  }
   0x9   : > { %p1904_p5 = por %p168_p2, %p167_p0  ;;  %p1908_p6 = por %p174_p4, %p173_p3 }
   0xa   : > { %p1636_p7 = scmp.ge.s32.totalorder %s1819_s24, 1  ;;  %p215_p8 = scmp.lt.s32.totalorder %s1819_s24, 3 }
   0xc   : > { %p216_p9 = pnand %p1636_p7, %p215_p8 }
   0xd   : > { %p245_p10 = scmp.lt.s32.totalorder (!%p216_p9), %s1887_s25, 1  ;;  %s1821_s14 = smov (!%p216_p9), 17   ;;  %v1823_v2 = vmov (!%p216_p9), 0   ;;  %v969_v3 = vld [vmem:[%s2358_s1] sm:$0xf] (!%p216_p9)  ;;  %v259_v4 = vlaneseq (!%p216_p9)  ;;  %vm315_vm3 = vcmask (!%p216_p9), 1041408  }
   0xe   : > { %219 = sbr.rel (%p216_p9) target bundleno = 802 (0x322), region = 44  ;;  %s1822_s15 = smov (!%p216_p9), 16   ;;  %354 = vmatprep.mubr.bf16.mxu0 (!%p216_p9), %v1823_v2  ;;  %404 = vmatprep.mubr.bf16.mxu1 (!%p216_p9), %v1823_v2  ;;  %v1654_v6 = vld [vmem:[%s2361_s4 + $0x8] sm:$0x3] (!%p216_p9)  ;;  %v264_v12 = vld [vmem:[%s2361_s4] sm:$0x3] (!%p216_p9) }
   0xf   : > { %1755 = vset.pattern.permute.xlu0 (!%p216_p9), %v1823_v2  ;;  %s1824_s16 = smov (!%p216_p9), 15   ;;  %s1825_s17 = smov (!%p216_p9), 1   ;;  %v267_v5 = vshrl.u32 (!%p216_p9), %v259_v4, 7  ;;  %v1976_v11 = vand.u32 (!%p216_p9), 127, %v259_v4  ;;  %v1640_v13 = vld [vmem:[%s2361_s4 + $0x2] sm:$0x3] (!%p216_p9) }
  0x10   : > { %s1826_s18 = smov (!%p216_p9), 127   ;;  %s1827_s19 = smov (!%p216_p9), 113   ;;  %v1646_v17 = vld [vmem:[%s2361_s4 + $0x4] sm:$0x3] (!%p216_p9)  ;;  %v1650_v35 = vld [vmem:[%s2361_s4 + $0x6] sm:$0x3] (!%p216_p9) }
  0x11   : > { %s1828_s20 = smov (!%p216_p9), 112   ;;  %s1829_s26 = smov (!%p216_p9), 111   ;;  %v1966_v7 = vsub.s32 (!%p216_p9), 0, %v267_v5  ;;  %v1968_v8 = vsub.s32 (!%p216_p9), 1, %v267_v5  ;;  %vm261_vm0 = vcmp.lt.s32.totalorder (!%p216_p9), %v1976_v11, 17  ;;  %vm287_vm1 = vcmp.lt.s32.totalorder (!%p216_p9), %v1976_v11, 16 }
  0x12   : > { %vm417_vm2 = vcmp.lt.s32.totalorder (!%p216_p9), %v1976_v11, 15  ;;  %vm497_vm4 = vcmp.lt.s32.totalorder (!%p216_p9), %v1976_v11, 1  ;;  %v1658_v47 = vld [vmem:[%s2361_s4 + $0xa] sm:$0x3] (!%p216_p9)  ;;  %vm311_vm5 = vcmask (!%p216_p9), 31744   ;;  %vm653_vm6 = vcmp.lt.s32.totalorder (!%p216_p9), %v1976_v11, 127 }
  0x13   : > { %v1971_v9 = vrot.slane (!%p216_p9), %v1654_v6, %v1966_v7  ;;  %v1974_v10 = vrot.slane (!%p216_p9), %v1654_v6, %v1968_v8  ;;  %v1992_v18 = vrot.slane (!%p216_p9), %v264_v12, %v1966_v7  ;;  %v1995_v19 = vrot.slane (!%p216_p9), %v1640_v13, %v1966_v7  ;;  %v1662_v4 = vld [vmem:[%s2361_s4 + $0xc] sm:$0x3] (!%p216_p9) }
  0x14   : > { %v1998_v20 = vrot.slane (!%p216_p9), %v1640_v13, %v1968_v8  ;;  %v2001_v21 = vrot.slane (!%p216_p9), %v264_v12, %v1968_v8  ;;  %v2006_v25 = vrot.slane (!%p216_p9), %v1646_v17, %v1966_v7  ;;  %v2009_v26 = vrot.slane (!%p216_p9), %v1646_v17, %v1968_v8  ;;  %v1641_v13 = vld [vmem:[%s2357_s0 + $0x2] sm:$0x3] (!%p216_p9) }
  0x15   : > { %s246_s9 = scalar_select %p245_p10, %s1887_s25, 1  ;;  %v586_v14 = vcombine.low %v1971_v9, %v1974_v10  ;;  %v2034_v45 = vrot.slane %v1650_v35, %v1966_v7  ;;  %v2037_v46 = vrot.slane %v1650_v35, %v1968_v8  ;;  %v2049_v59 = vrot.slane %v1658_v47, %v1966_v7  ;;  %v1666_v35 = vld [vmem:[%s2361_s4 + $0xe] sm:$0x3] }
  0x16   : > { %v2052_v60 = vrot.slane %v1658_v47, %v1968_v8  ;;  %vm733_vm7 = vcmp.lt.s32.totalorder %v1976_v11, 113  ;;  %vm813_vm8 = vcmp.lt.s32.totalorder %v1976_v11, 112  ;;  %vm893_vm9 = vcmp.lt.s32.totalorder %v1976_v11, 111 }
  0x17   : > { %s1705_s10 = sshll.u32 %s246_s9, 3 }
  0x18   : > { %s249_s13 = scalar_lea.vmem %s2362_s5, %s1705_s10 }
  0x19   : > { %v1919_v0 = vld [vmem:[%s249_s13] sm:$0xff] }
  0x1a   : > { %255 = vrot.lane.b32.xlu1 %v1919_v0, %s1821_s14  ;;  %283 = vrot.lane.b32.xlu0 %v1919_v0, %s1822_s15  ;;  %v1927_v1 = vcombine.high %v1919_v0, %v1919_v0  ;;  %v588_v22 = vmul.f32 %v586_v14, %v1919_v0  ;;  %v282_v14 = vld [vmem:[%s2357_s0] sm:$0x3] }
  0x1c   : > { %v2027_v36 = vmax.f32 %v588_v22, 0.0 }
  0x1e   : > { %257 = vrot.lane.b32.xlu1 %v1927_v1, %s1821_s14  ;;  %285 = vrot.lane.b32.xlu0 %v1927_v1, %s1822_s15  ;;  %v591_v54 = vcombine.high %v2027_v36, %v2027_v36 }
  0x22   : > { %415 = vrot.lane.b32.xlu1 %v1927_v1, %s1824_s16  ;;  %413 = vrot.lane.b32.xlu0 %v1919_v0, %s1824_s16 }
  0x26   : > { %495 = vrot.lane.b32.xlu1 %v1927_v1, %s1825_s17  ;;  %493 = vrot.lane.b32.xlu0 %v1919_v0, %s1825_s17 }
  0x2a   : > { %651 = vrot.lane.b32.xlu1 %v1927_v1, %s1826_s18  ;;  %649 = vrot.lane.b32.xlu0 %v1919_v0, %s1826_s18 }
  0x2e   : > { %731 = vrot.lane.b32.xlu1 %v1927_v1, %s1827_s19  ;;  %729 = vrot.lane.b32.xlu0 %v1919_v0, %s1827_s19 }
  0x32   : > { %811 = vrot.lane.b32.xlu1 %v1927_v1, %s1828_s20  ;;  %809 = vrot.lane.b32.xlu0 %v1919_v0, %s1828_s20 }
  0x36   : > { %891 = vrot.lane.b32.xlu1 %v1927_v1, %s1829_s26  ;;  %889 = vrot.lane.b32.xlu0 %v1919_v0, %s1829_s26 }
  0x3a   : > { %972 = vperm.xlu0 %1755, %v969_v3  }
  0x8c   : > { %v256_v15 = vpop.permute.xlu1 %255  ;;  %v284_v16 = vpop.permute.xlu0 %283 }
  0x90   : > { %v258_v23 = vpop.permute.xlu1 %257  ;;  %v286_v24 = vpop.permute.xlu0 %285 }
  0x91   : > { %v262_v27 = vsel %vm261_vm0, %v256_v15, %v258_v23  ;;  %v263_v28 = vsel %vm261_vm0, %v258_v23, %v256_v15  ;;  %v288_v29 = vsel %vm287_vm1, %v284_v16, %v286_v24  ;;  %v289_v30 = vsel %vm287_vm1, %v286_v24, %v284_v16 }
  0x92   : > { %v276_v31 = vmul.f32 %v1992_v18, %v263_v28  ;;  %v303_v32 = vmul.f32 %v1995_v19, %v289_v30  ;;  %v304_v33 = vmul.f32 %v1998_v20, %v288_v29  ;;  %v277_v34 = vmul.f32 %v2001_v21, %v262_v27 }
  0x93   : > { %v594_v16 = vpack.c.bf16 %v591_v54, %v591_v54  ;;  %v2075_v27 = vrot.slane %v1662_v4, %v1966_v7 }
  0x94   : > { %v416_v37 = vpop.permute.xlu1 %415  ;;  %v414_v38 = vpop.permute.xlu0 %413  ;;  %v306_v39 = vmax.f32 %v304_v33, 0.0  ;;  %v279_v40 = vmax.f32 %v277_v34, 0.0  ;;  %v305_v41 = vmax.f32 %v303_v32, 0.0  ;;  %v278_v42 = vmax.f32 %v276_v31, 0.0 }
  0x95   : > { %v418_v43 = vsel %vm417_vm2, %v414_v38, %v416_v37  ;;  %v419_v44 = vsel %vm417_vm2, %v416_v37, %v414_v38  ;;  %v2084_v31 = vrot.slane %v1662_v4, %v1968_v8  ;;  %v593_v38 = vpack.c.bf16 %v2027_v36, %v2027_v36 }
  0x96   : > { %v433_v48 = vmul.f32 %v2006_v25, %v419_v44  ;;  %v434_v49 = vmul.f32 %v2009_v26, %v418_v43  ;;  %v308_v50 = vpack.c.bf16 %v306_v39, %v306_v39  ;;  %v281_v51 = vpack.c.bf16 %v279_v40, %v279_v40 }
  0x97   : > { %v307_v52 = vpack.c.bf16 %v305_v41, %v305_v41  ;;  %v280_v53 = vpack.c.bf16 %v278_v42, %v278_v42  ;;  %v2108_v36 = vrot.slane %v1666_v35, %v1968_v8 }
  0x98   : > { %v435_v55 = vmax.f32 %v433_v48, 0.0  ;;  %v436_v56 = vmax.f32 %v434_v49, 0.0  ;;  %1642 = vmatprep.subr.msk.bf16.mxu0 %vm315_vm3, %v308_v50  ;;  %1644 = vmatprep.subr.msk.bf16.mxu1 %vm315_vm3, %v281_v51  ;;  %v496_v57 = vpop.permute.xlu1 %495  ;;  %v494_v58 = vpop.permute.xlu0 %493  ;;  %v2105_v48 = vrot.slane %v1666_v35, %v1966_v7  ;;  %v1647_v51 = vld [vmem:[%s2357_s0 + $0x4] sm:$0x3] }
  0x99   : > { %v317_v61 = vsel %vm315_vm3, %v307_v52, 0  ;;  %v367_v62 = vsel %vm315_vm3, %v280_v53, 0  ;;  %v498_v63 = vsel %vm497_vm4, %v494_v58, %v496_v57  ;;  %v499_v3 = vsel %vm497_vm4, %v496_v57, %v494_v58  ;;  %v1651_v52 = vld [vmem:[%s2357_s0 + $0x6] sm:$0x3] }
  0x9a   : > { %v437_v5 = vpack.c.bf16 %v435_v55, %v435_v55  ;;  %v438_v6 = vpack.c.bf16 %v436_v56, %v436_v56  ;;  %323 = vmatpush1.bf16.msra.mxu0 %v317_v61  ;;  %373 = vmatpush1.bf16.msra.mxu1 %v367_v62  ;;  %v513_v12 = vmul.f32 %v2034_v45, %v499_v3  ;;  %v1670_v55 = vld [vmem:[%s2361_s4 + $0x10] sm:$0x3]  ;;  %v601_v56 = vsel %vm315_vm3, %v593_v38, 0 }
  0x9b   : > { %v514_v15 = vmul.f32 %v2037_v46, %v498_v63 }
  0x9c   : > { %v515_v17 = vmax.f32 %v513_v12, 0.0  ;;  %1648 = vmatprep.subr.msk.bf16.mxu0 %vm315_vm3, %v438_v6  ;;  %v445_v22 = vsel %vm315_vm3, %v437_v5, 0  ;;  %v652_v23 = vpop.permute.xlu1 %651  ;;  %v650_v24 = vpop.permute.xlu0 %649  ;;  %v2132_v5 = vrot.slane %v1670_v55, %v1966_v7 }
  0x9d   : > { %v516_v28 = vmax.f32 %v514_v15, 0.0  ;;  %1643 = vmatmul.mubr.msk.bf16.vlgmr.msra.gmra.mrb[0].mxu0 %vm311_vm5, %v1641_v13  ;;  %1645 = vmatmul.mubr.msk.bf16.vlgmr.msra.gmra.mrb[0].mxu1 %vm311_vm5, %v282_v14  ;;  %v654_v29 = vsel %vm653_vm6, %v650_v24, %v652_v23  ;;  %v655_v30 = vsel %vm653_vm6, %v652_v23, %v650_v24  ;;  %v2137_v14 = vrot.slane %v1670_v55, %v1968_v8 }
  0x9e   : > { %v517_v32 = vpack.c.bf16 %v515_v17, %v515_v17  ;;  %451 = vmatpush1.bf16.msra.mxu0 %v445_v22  ;;  %v669_v33 = vmul.f32 %v2049_v59, %v654_v29  ;;  %v670_v34 = vmul.f32 %v2052_v60, %v655_v30  ;;  %482 = vmatprep.mubr.bf16.mxu0 %v1823_v2  ;;  %v1655_v29 = vld [vmem:[%s2357_s0 + $0x8] sm:$0x3]  ;;  %v1659_v30 = vld [vmem:[%s2357_s0 + $0xa] sm:$0x3] }
  0x9f   : > { %v518_v37 = vpack.c.bf16 %v516_v28, %v516_v28  ;;  %562 = vmatprep.mubr.bf16.mxu1 %v1823_v2  ;;  %1656 = vmatprep.subr.msk.bf16.mxu0 %vm315_vm3, %v594_v16 }
  0xa0   : > { %v671_v39 = vmax.f32 %v669_v33, 0.0  ;;  %v672_v40 = vmax.f32 %v670_v34, 0.0  ;;  %v525_v41 = vsel %vm315_vm3, %v517_v32, 0  ;;  %v732_v42 = vpop.permute.xlu1 %731  ;;  %v730_v43 = vpop.permute.xlu0 %729 }
  0xa1   : > { %1652 = vmatprep.subr.msk.bf16.mxu1 %vm315_vm3, %v518_v37  ;;  %v734_v44 = vsel %vm733_vm7, %v730_v43, %v732_v42  ;;  %v735_v47 = vsel %vm733_vm7, %v732_v42, %v730_v43  ;;  %v1667_v42 = vld [vmem:[%s2357_s0 + $0xe] sm:$0x3] }
  0xa2   : > { %v673_v49 = vpack.c.bf16 %v671_v39, %v671_v39  ;;  %v674_v50 = vpack.c.bf16 %v672_v40, %v672_v40  ;;  %531 = vmatpush1.bf16.msra.mxu1 %v525_v41  ;;  %v749_v53 = vmul.f32 %v2075_v27, %v734_v44  ;;  %v750_v54 = vmul.f32 %v2084_v31, %v735_v47  ;;  %v1663_v41 = vld [vmem:[%s2357_s0 + $0xc] sm:$0x3]  ;;  %v1671_v44 = vld [vmem:[%s2357_s0 + $0x10] sm:$0x3] }
  0xa4   : > { %v751_v57 = vmax.f32 %v749_v53, 0.0  ;;  %v752_v58 = vmax.f32 %v750_v54, 0.0  ;;  %v812_v61 = vpop.permute.xlu1 %811  ;;  %1660 = vmatprep.subr.msk.bf16.mxu1 %vm315_vm3, %v674_v50  ;;  %v810_v62 = vpop.permute.xlu0 %809  ;;  %v681_v63 = vsel %vm315_vm3, %v673_v49, 0 }
  0xa5   : > { %1649 = vmatmul.mubr.msk.bf16.vlgmr.msra.gmra.mrb[4].mxu0 %vm311_vm5, %v1647_v51  ;;  %1653 = vmatmul.mubr.msk.bf16.vlgmr.msra.gmra.mrb[4].mxu1 %vm311_vm5, %v1651_v52  ;;  %v814_v3 = vsel %vm813_vm8, %v810_v62, %v812_v61  ;;  %v815_v4 = vsel %vm813_vm8, %v812_v61, %v810_v62 }
  0xa6   : > { %v754_v6 = vpack.c.bf16 %v752_v58, %v752_v58  ;;  %607 = vmatpush1.bf16.msra.mxu0 %v601_v56  ;;  %v829_v12 = vmul.f32 %v2105_v48, %v814_v3  ;;  %v830_v13 = vmul.f32 %v2108_v36, %v815_v4  ;;  %v753_v15 = vpack.c.bf16 %v751_v57, %v751_v57 }
  0xa7   : > { %638 = vmatprep.mubr.bf16.mxu0 %v1823_v2  ;;  %687 = vmatpush1.bf16.msra.mxu1 %v681_v63 }
  0xa8   : > { %v831_v16 = vmax.f32 %v829_v12, 0.0  ;;  %v832_v17 = vmax.f32 %v830_v13, 0.0  ;;  %718 = vmatprep.mubr.bf16.mxu1 %v1823_v2  ;;  %v892_v22 = vpop.permute.xlu1 %891  ;;  %1664 = vmatprep.subr.msk.bf16.mxu0 %vm315_vm3, %v754_v6  ;;  %v890_v7 = vpop.permute.xlu0 %889  ;;  %v761_v34 = vsel %vm315_vm3, %v753_v15, 0 }
  0xa9   : > { %v894_v23 = vsel %vm893_vm9, %v890_v7, %v892_v22  ;;  %v895_v24 = vsel %vm893_vm9, %v892_v22, %v890_v7 }
  0xaa   : > { %v833_v8 = vpack.c.bf16 %v831_v16, %v831_v16  ;;  %v834_v28 = vpack.c.bf16 %v832_v17, %v832_v17  ;;  %v909_v32 = vmul.f32 %v2132_v5, %v894_v23  ;;  %v910_v33 = vmul.f32 %v2137_v14, %v895_v24 }
  0xac   : > { %v911_v35 = vmax.f32 %v909_v32, 0.0  ;;  %v912_v37 = vmax.f32 %v910_v33, 0.0  ;;  %1668 = vmatprep.subr.msk.bf16.mxu1 %vm315_vm3, %v834_v28  ;;  %v841_v38 = vsel %vm315_vm3, %v833_v8, 0 }
  0xad   : > { %1657 = vmatmul.mubr.msk.bf16.vlgmr.msra.gmra.mrb[8].mxu0 %vm311_vm5, %v1655_v29  ;;  %1661 = vmatmul.mubr.msk.bf16.vlgmr.msra.gmra.mrb[8].mxu1 %vm311_vm5, %v1659_v30 }
  0xae   : > { %v914_v39 = vpack.c.bf16 %v912_v37, %v912_v37  ;;  %767 = vmatpush1.bf16.msra.mxu0 %v761_v34  ;;  %798 = vmatprep.mubr.bf16.mxu0 %v1823_v2  ;;  %v913_v40 = vpack.c.bf16 %v911_v35, %v911_v35 }
  0xaf   : > { %847 = vmatpush1.bf16.msra.mxu1 %v841_v38  ;;  %878 = vmatprep.mubr.bf16.mxu1 %v1823_v2 }
  0xb0   : > { %1672 = vmatprep.subr.msk.bf16.mxu0 %vm315_vm3, %v914_v39  ;;  %v921_v43 = vsel %vm315_vm3, %v913_v40, 0 }
  0xb5   : > { %1665 = vmatmul.mubr.msk.bf16.vlgmr.msra.gmra.mrb[12].mxu0 %vm311_vm5, %v1663_v41  ;;  %1669 = vmatmul.mubr.msk.bf16.vlgmr.msra.gmra.mrb[12].mxu1 %vm311_vm5, %v1667_v42 }
  0xb6   : > { %927 = vmatpush1.bf16.msra.mxu0 %v921_v43  ;;  %958 = vmatprep.mubr.bf16.mxu0 %v1823_v2 }
  0xb7   : > { %1043 = vmatprep.mubr.bf16.mxu1 %v1823_v2 }
  0xbd   : > { %1673 = vmatmul.mubr.msk.bf16.vlgmr.msra.gmra.mrb[16].mxu0 %vm311_vm5, %v1671_v44 }
  0xbe   : > { %1093 = vmatprep.mubr.bf16.mxu0 %v1823_v2 }
 0x170   : > { %v356_v47 = vpop.f32.mrb[0].mxu0  ;;  %v406_v49 = vpop.f32.mrb[0].mxu1 }
 0x171   : > { %v407_v50 = vadd.f32 %v406_v49, %v356_v47  ;;  %v358_v51 = vpop.f32.mrb[1].mxu0  ;;  %v408_v52 = vpop.f32.mrb[1].mxu1 }
 0x172   : > { %v409_v53 = vadd.f32 %v408_v52, %v358_v51  ;;  %v360_v54 = vpop.f32.mrb[2].mxu0  ;;  %v410_v55 = vpop.f32.mrb[2].mxu1 }
 0x173   : > { %v361_v56 = vpop.f32.mrb[3].mxu0  ;;  %v411_v57 = vpop.f32.mrb[3].mxu1 }
 0x178   : > { %v484_v58 = vpop.f32.mrb[4].mxu0  ;;  %v564_v61 = vpop.f32.mrb[4].mxu1 }
 0x179   : > { %v491_v62 = vadd.f32 %v484_v58, %v407_v50  ;;  %v486_v63 = vpop.f32.mrb[5].mxu0  ;;  %v566_v3 = vpop.f32.mrb[5].mxu1 }
 0x17a   : > { %v492_v4 = vadd.f32 %v486_v63, %v409_v53  ;;  %v488_v6 = vpop.f32.mrb[6].mxu0  ;;  %v568_v12 = vpop.f32.mrb[6].mxu1 }
 0x17b   : > { %v571_v13 = vadd.f32 %v564_v61, %v491_v62  ;;  %v489_v15 = vpop.f32.mrb[7].mxu0  ;;  %v569_v16 = vpop.f32.mrb[7].mxu1 }
 0x17c   : > { %v572_v17 = vadd.f32 %v566_v3, %v492_v4  ;;  %v973_v53 = vpop.permute.xlu0 %972  ;;  %v1544_v4 = vld [vmem:[%s2360_s3] sm:$0xf] }
 0x180   : > { %v640_v22 = vpop.f32.mrb[8].mxu0  ;;  %v720_v7 = vpop.f32.mrb[8].mxu1 }
 0x181   : > { %v647_v23 = vadd.f32 %v640_v22, %v571_v13  ;;  %v642_v24 = vpop.f32.mrb[9].mxu0  ;;  %v722_v8 = vpop.f32.mrb[9].mxu1 }
 0x182   : > { %v648_v28 = vadd.f32 %v642_v24, %v572_v17  ;;  %v644_v29 = vpop.f32.mrb[10].mxu0  ;;  %v724_v30 = vpop.f32.mrb[10].mxu1 }
 0x183   : > { %v727_v32 = vadd.f32 %v720_v7, %v647_v23  ;;  %v645_v33 = vpop.f32.mrb[11].mxu0  ;;  %v725_v34 = vpop.f32.mrb[11].mxu1 }
 0x184   : > { %v728_v35 = vadd.f32 %v722_v8, %v648_v28 }
 0x188   : > { %v800_v37 = vpop.f32.mrb[12].mxu0  ;;  %v880_v38 = vpop.f32.mrb[12].mxu1 }
 0x189   : > { %v807_v39 = vadd.f32 %v800_v37, %v727_v32  ;;  %v802_v40 = vpop.f32.mrb[13].mxu0  ;;  %v882_v41 = vpop.f32.mrb[13].mxu1 }
 0x18a   : > { %v808_v42 = vadd.f32 %v802_v40, %v728_v35  ;;  %v804_v43 = vpop.f32.mrb[14].mxu0  ;;  %v884_v44 = vpop.f32.mrb[14].mxu1 }
 0x18b   : > { %v887_v47 = vadd.f32 %v880_v38, %v807_v39  ;;  %v805_v49 = vpop.f32.mrb[15].mxu0  ;;  %v885_v50 = vpop.f32.mrb[15].mxu1  ;;  %v989_v44 = vld [vmem:[%s2359_s2] sm:$0x3] }
 0x18c   : > { %v888_v51 = vadd.f32 %v882_v41, %v808_v42 }
 0x190   : > { %v960_v52 = vpop.f32.mrb[16].mxu0 }
 0x191   : > { %v967_v54 = vadd.f32 %v960_v52, %v887_v47  ;;  %v962_v55 = vpop.f32.mrb[17].mxu0 }
 0x192   : > { %v968_v56 = vadd.f32 %v962_v55, %v888_v51  ;;  %v964_v57 = vpop.f32.mrb[18].mxu0 }
 0x193   : > { %v975_v58 = vadd.f32 %v973_v53, %v967_v54  ;;  %v965_v61 = vpop.f32.mrb[19].mxu0  ;;  %v1679_v54 = vld [vmem:[%s2359_s2 + $0x4] sm:$0x3] }
 0x194   : > { %v976_v62 = vadd.f32 %v973_v53, %v968_v56 }
 0x195   : > { %v977_v63 = vmax.f32 %v975_v58, 0.0 }
 0x196   : > { %v978_v3 = vmax.f32 %v976_v62, 0.0 }
 0x197   : > { %979 = vrot.lane.b32.xlu0 %v977_v63, %s1821_s14  ;;  %990 = vrot.lane.b32.xlu1 %v977_v63, %s1822_s15 }
 0x198   : > { %v1231_v43 = vmul.f32 %v978_v3, %v1974_v10 }
 0x19a   : > { %v1233_v53 = vpack.c.bf16 %v1231_v43, %v1231_v43 }
 0x19b   : > { %1102 = vrot.lane.b32.xlu0 %v977_v63, %s1824_s16  ;;  %992 = vrot.lane.b32.xlu1 %v978_v3, %s1822_s15 }
 0x19f   : > { %1166 = vrot.lane.b32.xlu0 %v977_v63, %s1825_s17  ;;  %981 = vrot.lane.b32.xlu1 %v978_v3, %s1821_s14 }
 0x1a3   : > { %1288 = vrot.lane.b32.xlu0 %v977_v63, %s1826_s18  ;;  %1104 = vrot.lane.b32.xlu1 %v978_v3, %s1824_s16 }
 0x1a7   : > { %1352 = vrot.lane.b32.xlu0 %v977_v63, %s1827_s19  ;;  %1168 = vrot.lane.b32.xlu1 %v978_v3, %s1825_s17 }
 0x1ab   : > { %1416 = vrot.lane.b32.xlu0 %v977_v63, %s1828_s20  ;;  %1290 = vrot.lane.b32.xlu1 %v978_v3, %s1826_s18  ;;  %s242_s18 = sand.u32 1, %s1811_s22  }
 0x1ac   : > { %s1560_s29 = scalar_lea.sflag [#allocation3], %s242_s18 }
 0x1af   : > { %1480 = vrot.lane.b32.xlu0 %v977_v63, %s1829_s26  ;;  %1354 = vrot.lane.b32.xlu1 %v978_v3, %s1827_s19  ;;  %s1637_s19 = sshll.u32 %s242_s18, 3 }
 0x1b3   : > { %1547 = vperm.xlu0 %1755, %v1544_v4   ;;  %1418 = vrot.lane.b32.xlu1 %v978_v3, %s1828_s20  ;;  %v1682_v4 = vld [vmem:[%s2359_s2 + $0x6] sm:$0x3]  ;;  %s1706_s20 = sshll.u32 %s1887_s25, 7  ;;  %s1830_s25 = smov [#allocation2]  }
 0x1b4   : > { %s2315_s28 = scalar_lea.hbm %s2363_s6, %s1706_s20  ;;  %s1761_s15 = sshll.u32 %s1830_s25, 4  ;;  %s1762_s15 = int_to_ptr.vmem [resolvable:$false] %s1761_s15 }
 0x1b5   : > { %s1763_s10 = scalar_lea.vmem %s1762_s15, 256 }
 0x1b7   : > { %1482 = vrot.lane.b32.xlu1 %v978_v3, %s1829_s26  ;;  %s244_s26 = scalar_lea.vmem [#allocation2], %s1637_s19 }
 0x1b8   : > { %s1574_s11 = sshll.u32 %s244_s26, 4  ;;  %s2317_s11 = int_to_ptr.vmem [resolvable:$true] %s1574_s11 }
 0x1b9   : > { %s1757_s9 = scalar_lea.vmem %s2317_s11, 128  ;;  %p1764_p0 = scmp.lt.s32.totalorder %s2317_s11, %s1762_s15 }
 0x1ba   : > { %p1758_p11 = scmp.ne.s32.totalorder %s2317_s11, %s1757_s9  ;;  %p1765_p1 = scmp.lt.s32.totalorder %s1763_s10, %s1757_s9 }
 0x1bc   : > { %p1759_p12 = pnand %p1758_p11, %p1904_p5  ;;  %p1766_p2 = por %p1765_p1, %p1764_p0 }
 0x1be   : > { %p1760_p13 = pneg %p1759_p12 }
 0x1c0   : > { %p1767_p3 = pnand %p1766_p2, %p1760_p13 }
 0x209   : > { %v980_v6 = vpop.permute.xlu0 %979  ;;  %v991_v12 = vpop.permute.xlu1 %990 }
 0x20d   : > { %v1103_v13 = vpop.permute.xlu0 %1102  ;;  %v993_v15 = vpop.permute.xlu1 %992 }
 0x20e   : > { %v994_v16 = vsel %vm287_vm1, %v991_v12, %v993_v15  ;;  %v995_v17 = vsel %vm287_vm1, %v993_v15, %v991_v12 }
 0x20f   : > { %v996_v22 = vmul.f32 %v995_v17, %v1995_v19  ;;  %v997_v7 = vmul.f32 %v994_v16, %v1998_v20  ;;  %v1674_v20 = vld [vmem:[%s2359_s2 + $0x2] sm:$0x3] }
 0x211   : > { %v998_v23 = vpack.c.bf16 %v996_v22, %v996_v22  ;;  %v999_v24 = vpack.c.bf16 %v997_v7, %v997_v7  ;;  %v1167_v8 = vpop.permute.xlu0 %1166  ;;  %v982_v28 = vpop.permute.xlu1 %981  ;;  %v1685_v7 = vld [vmem:[%s2359_s2 + $0x8] sm:$0x3] }
 0x212   : > { %v983_v29 = vsel %vm261_vm0, %v980_v6, %v982_v28  ;;  %v984_v30 = vsel %vm261_vm0, %v982_v28, %v980_v6 }
 0x213   : > { %v985_v32 = vmul.f32 %v984_v30, %v1992_v18  ;;  %v986_v33 = vmul.f32 %v983_v29, %v2001_v21  ;;  %1675 = vmatprep.subr.msk.bf16.mxu1 %vm315_vm3, %v999_v24  ;;  %v1006_v19 = vsel %vm315_vm3, %v998_v23, 0  ;;  %v1230_v21 = vmul.f32 %v977_v63, %v1971_v9 }
 0x214   : > { %1012 = vmatpush1.bf16.msra.mxu1 %v1006_v19 }
 0x215   : > { %v987_v34 = vpack.c.bf16 %v985_v32, %v985_v32  ;;  %v988_v35 = vpack.c.bf16 %v986_v33, %v986_v33  ;;  %v1105_v37 = vpop.permute.xlu1 %1104  ;;  %v1289_v39 = vpop.permute.xlu0 %1288  ;;  %v1232_v50 = vpack.c.bf16 %v1230_v21, %v1230_v21  ;;  %v1688_v32 = vld [vmem:[%s2359_s2 + $0xa] sm:$0x3] }
 0x216   : > { %v1106_v38 = vsel %vm417_vm2, %v1103_v13, %v1105_v37  ;;  %v1107_v18 = vsel %vm417_vm2, %v1105_v37, %v1103_v13 }
 0x217   : > { %v1108_v40 = vmul.f32 %v1107_v18, %v2006_v25  ;;  %v1109_v41 = vmul.f32 %v1106_v38, %v2009_v26  ;;  %1676 = vmatmul.mubr.msk.bf16.vlgmr.msra.gmra.mrb[16].mxu1 %vm311_vm5, %v1674_v20  ;;  %1677 = vmatprep.subr.msk.bf16.mxu0 %vm315_vm3, %v988_v35  ;;  %v1056_v42 = vsel %vm315_vm3, %v987_v34, 0  ;;  %v1240_v3 = vsel %vm315_vm3, %v1232_v50, 0  ;;  %v1691_v18 = vld [vmem:[%s2359_s2 + $0xc] sm:$0x3] }
 0x218   : > { %1062 = vmatpush1.bf16.msra.mxu0 %v1056_v42  ;;  %1155 = vmatprep.mubr.bf16.mxu1 %v1823_v2 }
 0x219   : > { %v1110_v9 = vpack.c.bf16 %v1108_v40, %v1108_v40  ;;  %v1111_v47 = vpack.c.bf16 %v1109_v41, %v1109_v41  ;;  %v1169_v25 = vpop.permute.xlu1 %1168  ;;  %v1353_v55 = vpop.permute.xlu0 %1352 }
 0x21a   : > { %v1170_v26 = vsel %vm497_vm4, %v1167_v8, %v1169_v25  ;;  %v1171_v49 = vsel %vm497_vm4, %v1169_v25, %v1167_v8 }
 0x21b   : > { %v1172_v51 = vmul.f32 %v1171_v49, %v2034_v45  ;;  %v1173_v10 = vmul.f32 %v1170_v26, %v2037_v46  ;;  %1678 = vmatmul.mubr.msk.bf16.vlgmr.msra.gmra.mrb[20].mxu0 %vm311_vm5, %v989_v44  ;;  %1680 = vmatprep.subr.msk.bf16.mxu1 %vm315_vm3, %v1111_v47  ;;  %v1118_v52 = vsel %vm315_vm3, %v1110_v9, 0 }
 0x21c   : > { %1124 = vmatpush1.bf16.msra.mxu1 %v1118_v52  ;;  %1219 = vmatprep.mubr.bf16.mxu0 %v1823_v2 }
 0x21d   : > { %v1174_v56 = vpack.c.bf16 %v1172_v51, %v1172_v51  ;;  %v1175_v57 = vpack.c.bf16 %v1173_v10, %v1173_v10  ;;  %1686 = vmatprep.subr.msk.bf16.mxu1 %vm315_vm3, %v1233_v53  ;;  %v1291_v45 = vpop.permute.xlu1 %1290  ;;  %v1417_v15 = vpop.permute.xlu0 %1416 }
 0x21e   : > { %v1292_v46 = vsel %vm653_vm6, %v1289_v39, %v1291_v45  ;;  %v1293_v58 = vsel %vm653_vm6, %v1291_v45, %v1289_v39  ;;  %v1697_v39 = vld [vmem:[%s2359_s2 + $0x10] sm:$0x3] }
 0x21f   : > { %v1294_v61 = vmul.f32 %v1292_v46, %v2049_v59  ;;  %v1295_v62 = vmul.f32 %v1293_v58, %v2052_v60  ;;  %1681 = vmatmul.mubr.msk.bf16.vlgmr.msra.gmra.mrb[20].mxu1 %vm311_vm5, %v1679_v54  ;;  %1683 = vmatprep.subr.msk.bf16.mxu0 %vm315_vm3, %v1175_v57  ;;  %v1182_v63 = vsel %vm315_vm3, %v1174_v56, 0 }
 0x220   : > { %1188 = vmatpush1.bf16.msra.mxu0 %v1182_v63  ;;  %1246 = vmatpush1.bf16.msra.mxu1 %v1240_v3 }
 0x221   : > { %v1296_v6 = vpack.c.bf16 %v1294_v61, %v1294_v61  ;;  %v1297_v12 = vpack.c.bf16 %v1295_v62, %v1295_v62  ;;  %v1355_v13 = vpop.permute.xlu1 %1354  ;;  %1277 = vmatprep.mubr.bf16.mxu1 %v1823_v2  ;;  %v1481_v33 = vpop.permute.xlu0 %1480 }
 0x222   : > { %v1356_v59 = vsel %vm733_vm7, %v1353_v55, %v1355_v13  ;;  %v1357_v60 = vsel %vm733_vm7, %v1355_v13, %v1353_v55 }
 0x223   : > { %v1358_v16 = vmul.f32 %v1356_v59, %v2075_v27  ;;  %v1359_v17 = vmul.f32 %v1357_v60, %v2084_v31  ;;  %1684 = vmatmul.mubr.msk.bf16.vlgmr.msra.gmra.mrb[24].mxu0 %vm311_vm5, %v1682_v4  ;;  %1689 = vmatprep.subr.msk.bf16.mxu0 %vm315_vm3, %v1297_v12  ;;  %v1304_v22 = vsel %vm315_vm3, %v1296_v6, 0 }
 0x224   : > { %1310 = vmatpush1.bf16.msra.mxu0 %v1304_v22  ;;  %1341 = vmatprep.mubr.bf16.mxu0 %v1823_v2 }
 0x225   : > { %v1360_v23 = vpack.c.bf16 %v1358_v16, %v1358_v16  ;;  %v1361_v24 = vpack.c.bf16 %v1359_v17, %v1359_v17  ;;  %v1419_v8 = vpop.permute.xlu1 %1418 }
 0x226   : > { %v1420_v27 = vsel %vm813_vm8, %v1417_v15, %v1419_v8  ;;  %v1421_v31 = vsel %vm813_vm8, %v1419_v8, %v1417_v15 }
 0x227   : > { %v1422_v28 = vmul.f32 %v1420_v27, %v2105_v48  ;;  %v1423_v29 = vmul.f32 %v1421_v31, %v2108_v36  ;;  %1687 = vmatmul.mubr.msk.bf16.vlgmr.msra.gmra.mrb[24].mxu1 %vm311_vm5, %v1685_v7  ;;  %1692 = vmatprep.subr.msk.bf16.mxu1 %vm315_vm3, %v1361_v24  ;;  %v1368_v30 = vsel %vm315_vm3, %v1360_v23, 0 }
 0x228   : > { %1374 = vmatpush1.bf16.msra.mxu1 %v1368_v30  ;;  %1405 = vmatprep.mubr.bf16.mxu1 %v1823_v2 }
 0x229   : > { %v1424_v19 = vpack.c.bf16 %v1422_v28, %v1422_v28  ;;  %v1425_v20 = vpack.c.bf16 %v1423_v29, %v1423_v29  ;;  %v1483_v34 = vpop.permute.xlu1 %1482 }
 0x22a   : > { %v1484_v48 = vsel %vm893_vm9, %v1481_v33, %v1483_v34  ;;  %v1485_v36 = vsel %vm893_vm9, %v1483_v34, %v1481_v33 }
 0x22b   : > { %v1486_v35 = vmul.f32 %v1484_v48, %v2132_v5  ;;  %v1487_v37 = vmul.f32 %v1485_v36, %v2137_v14  ;;  %1690 = vmatmul.mubr.msk.bf16.vlgmr.msra.gmra.mrb[28].mxu0 %vm311_vm5, %v1688_v32  ;;  %1695 = vmatprep.subr.msk.bf16.mxu0 %vm315_vm3, %v1425_v20  ;;  %v1432_v38 = vsel %vm315_vm3, %v1424_v19, 0  ;;  %v1694_v14 = vld [vmem:[%s2359_s2 + $0xe] sm:$0x3] }
 0x22c   : > { %1438 = vmatpush1.bf16.msra.mxu0 %v1432_v38  ;;  %1469 = vmatprep.mubr.bf16.mxu0 %v1823_v2 }
 0x22d   : > { %v1488_v21 = vpack.c.bf16 %v1486_v35, %v1486_v35  ;;  %v1489_v11 = vpack.c.bf16 %v1487_v37, %v1487_v37 }
 0x22f   : > { %1693 = vmatmul.mubr.msk.bf16.vlgmr.msra.gmra.mrb[28].mxu1 %vm311_vm5, %v1691_v18  ;;  %1698 = vmatprep.subr.msk.bf16.mxu1 %vm315_vm3, %v1489_v11  ;;  %v1496_v5 = vsel %vm315_vm3, %v1488_v21, 0 }
 0x230   : > { %1502 = vmatpush1.bf16.msra.mxu1 %v1496_v5  ;;  %1533 = vmatprep.mubr.bf16.mxu1 %v1823_v2 }
 0x232   : > { %v1548_v20 = vpop.permute.xlu0 %1547 }
 0x233   : > { %1696 = vmatmul.mubr.msk.bf16.vlgmr.msra.gmra.mrb[32].mxu0 %vm311_vm5, %v1694_v14 }
 0x237   : > { %1699 = vmatmul.mubr.msk.bf16.vlgmr.msra.gmra.mrb[32].mxu1 %vm311_vm5, %v1697_v39 }
 0x2ea   : > { %v1045_v40 = vpop.f32.mrb[16].mxu1 }
 0x2eb   : > { %v1047_v41 = vpop.f32.mrb[17].mxu1 }
 0x2ec   : > { %v1049_v42 = vpop.f32.mrb[18].mxu1 }
 0x2ed   : > { %v1050_v43 = vpop.f32.mrb[19].mxu1 }
 0x2ee   : > { %v1095_v44 = vpop.f32.mrb[20].mxu0 }
 0x2ef   : > { %v1096_v9 = vadd.f32 %v1095_v44, %v1045_v40  ;;  %v1097_v47 = vpop.f32.mrb[21].mxu0 }
 0x2f0   : > { %v1098_v25 = vadd.f32 %v1097_v47, %v1047_v41  ;;  %v1099_v26 = vpop.f32.mrb[22].mxu0 }
 0x2f1   : > { %v1100_v49 = vpop.f32.mrb[23].mxu0 }
 0x2f2   : > { %v1157_v50 = vpop.f32.mrb[20].mxu1 }
 0x2f3   : > { %v1164_v2 = vadd.f32 %v1157_v50, %v1096_v9  ;;  %v1159_v51 = vpop.f32.mrb[21].mxu1 }
 0x2f4   : > { %v1165_v10 = vadd.f32 %v1159_v51, %v1098_v25  ;;  %v1161_v52 = vpop.f32.mrb[22].mxu1 }
 0x2f5   : > { %v1162_v53 = vpop.f32.mrb[23].mxu1 }
 0x2f6   : > { %v1221_v54 = vpop.f32.mrb[24].mxu0 }
 0x2f7   : > { %v1228_v55 = vadd.f32 %v1221_v54, %v1164_v2  ;;  %v1223_v56 = vpop.f32.mrb[25].mxu0 }
 0x2f8   : > { %v1229_v57 = vadd.f32 %v1223_v56, %v1165_v10  ;;  %v1225_v45 = vpop.f32.mrb[26].mxu0 }
 0x2f9   : > { %v1226_v46 = vpop.f32.mrb[27].mxu0 }
 0x2fa   : > { %v1279_v58 = vpop.f32.mrb[24].mxu1 }
 0x2fb   : > { %v1286_v61 = vadd.f32 %v1279_v58, %v1228_v55  ;;  %v1281_v62 = vpop.f32.mrb[25].mxu1 }
 0x2fc   : > { %v1287_v63 = vadd.f32 %v1281_v62, %v1229_v57  ;;  %v1283_v3 = vpop.f32.mrb[26].mxu1 }
 0x2fd   : > { %v1284_v4 = vpop.f32.mrb[27].mxu1 }
 0x2fe   : > { %v1343_v6 = vpop.f32.mrb[28].mxu0 }
 0x2ff   : > { %v1350_v12 = vadd.f32 %v1343_v6, %v1286_v61  ;;  %v1345_v13 = vpop.f32.mrb[29].mxu0 }
 0x300   : > { %v1351_v59 = vadd.f32 %v1345_v13, %v1287_v63  ;;  %v1347_v60 = vpop.f32.mrb[30].mxu0 }
 0x301   : > { %v1348_v15 = vpop.f32.mrb[31].mxu0 }
 0x302   : > { %v1407_v16 = vpop.f32.mrb[28].mxu1 }
 0x303   : > { %v1414_v17 = vadd.f32 %v1407_v16, %v1350_v12  ;;  %v1409_v22 = vpop.f32.mrb[29].mxu1 }
 0x304   : > { %v1415_v7 = vadd.f32 %v1409_v22, %v1351_v59  ;;  %v1411_v23 = vpop.f32.mrb[30].mxu1 }
 0x305   : > { %v1412_v24 = vpop.f32.mrb[31].mxu1 }
 0x306   : > { %v1471_v8 = vpop.f32.mrb[32].mxu0 }
 0x307   : > { %v1478_v27 = vadd.f32 %v1471_v8, %v1414_v17  ;;  %v1473_v31 = vpop.f32.mrb[33].mxu0 }
 0x308   : > { %v1479_v28 = vadd.f32 %v1473_v31, %v1415_v7  ;;  %v1475_v29 = vpop.f32.mrb[34].mxu0 }
 0x309   : > { %v1476_v30 = vpop.f32.mrb[35].mxu0 }
 0x30a   : > { %v1535_v32 = vpop.f32.mrb[32].mxu1 }
 0x30b   : > { %v1542_v33 = vadd.f32 %v1535_v32, %v1478_v27  ;;  %v1537_v19 = vpop.f32.mrb[33].mxu1 }
 0x30c   : > { %v1543_v34 = vadd.f32 %v1537_v19, %v1479_v28  ;;  %v1539_v48 = vpop.f32.mrb[34].mxu1 }
 0x30d   : > { %v1550_v36 = vadd.f32 %v1548_v20, %v1542_v33  ;;  %v1540_v35 = vpop.f32.mrb[35].mxu1 }
 0x30e   : > { %v1551_v37 = vadd.f32 %v1548_v20, %v1543_v34 }
 0x30f   : > { %v1552_v38 = vadd.f32 %v1550_v36, %v1919_v0 }
 0x310   : > { %v1553_v18 = vadd.f32 %v1551_v37, %v1927_v1 }
 0x312   : > { %v1556_v21 = vcombine.low %v1552_v38, %v1553_v18 }
 0x314   : > { %1558 = vst [vmem:[%s244_s26] sm:$0xff] %v1556_v21 }
 0x315   : > { %1770 = shalt.err (!%p1767_p3)
}
 0x316   : > { %s1771_s14 = scalar_lea.hbm %s2315_s28, 128  ;;  %s1775_s18 = scalar_lea.hbm %s2363_s6, 256 }
 0x317   : > { %p1772_p4 = scmp.ne.s32.totalorder %s2315_s28, %s1771_s14  ;;  %p1776_p9 = scmp.lt.u32.totalorder %s2315_s28, %s2363_s6 }
 0x318   : > { %p1777_p10 = scmp.lt.u32.totalorder %s1775_s18, %s1771_s14  ;;  %p1779_p12 = scmp.lt.u32.totalorder %s1771_s14, %s2315_s28 }
 0x319   : > { %p1773_p7 = pnand %p1772_p4, %p1904_p5 }
 0x31a   : > { %p1778_p11 = por %p1777_p10, %p1776_p9 }
 0x31b   : > { %p1774_p8 = pneg %p1773_p7 }
 0x31c   : > { %p1780_p13 = por %p1779_p12, %p1778_p11 }
 0x31e   : > { %p1781_p0 = pnand %p1780_p13, %p1774_p8 }
 0x320   : > { %1784 = shalt.err (!%p1781_p0)
}
 0x321   : > { %1707 = dma.vmem_to_hbm [thread:$0]  (%p1904_p5), %s2317_s11, 128, %s2315_s28, %s1560_s29  }
 0x322 PF: > { %p1713_p1 = scmp.ge.s32.totalorder %s1819_s24, 2  ;;  %s1586_s26 = sand.u32 1, %s1807_s21  }
 0x323   : > { %s1587_s12 = scalar_lea.sflag [#allocation3], %s1586_s26 }
 0x324   : > { %p1710_p2 = pnand %p1713_p1, %p1908_p6 }
 0x326   : > { %1802 = dma.done.wait (!%p1710_p2), %s1587_s12, 128  }
 0x327   : > { %1804 = vsyncadd (!%p1710_p2), %s1587_s12, 4294967168  ;;  %p16_p3 = scmp.ge.s32.totalorder %s1891_s27, 4   ;;  %s2366_s21 = smov %s1811_s22 }
 0x328   : > { %s2367_s22 = smov %s1815_s23  ;;  %s2368_s23 = smov %s1902_s30 }
 0x329   : > { %s2369_s24 = smov %s1891_s27  ;;  %18 = sbr.rel (!%p16_p3) target bundleno = 3 (0x3), region = 103 }
 0x330   :  { %1592 = vsyncpa [#allocation3], 1 }
 0x331   :  { %1594 = vsyncpa [#allocation3 + $0x1], 1 }

</bundles_post_ra>
